<compile_context>
chip_gen: v6e
topology: v6e:2x2x1
jax: 0.10.0
libtpu: 0.0.40
codegen_flags: <defaults>
</compile_context>

<pallas_src>
import functools
import math

import jax
import jax.numpy as jnp
from jax import lax
from jax.experimental import pallas as pl
from jax.experimental.pallas import tpu as pltpu


# Finite "-inf": (-1e30) - (-1e30) == 0, so even a fully-masked sequence split
# can never produce NaN in the online softmax (exp(0) = 1 instead of exp(nan)).
_MASK_VALUE = -1e30


def _round_up(a, b):
    return ((a + b - 1) // b) * b


def _online_softmax_step(n_idx, q, wkv, x, mask, d_latent, m_sc, l_sc, acc_sc):
    """One sequence tile of the flash-style cross-attention reduction."""

    @pl.when(n_idx == 0)
    def _init():
        m_sc[...] = jnp.full(m_sc.shape, _MASK_VALUE, dtype=m_sc.dtype)
        l_sc[...] = jnp.zeros(l_sc.shape, dtype=l_sc.dtype)
        acc_sc[...] = jnp.zeros(acc_sc.shape, dtype=acc_sc.dtype)

    # Fused K|V projection for this tile: one (tile_n, d_model) x (d_model, 2*d_latent)
    # MXU pass, emitted directly in the compute dtype (MXU still accumulates in
    # f32 internally; no separate cast pass over the result). Biases omitted:
    # bk is a per-latent score shift (softmax-invariant), bv is added at finalize.
    kv = jnp.dot(x, wkv, preferred_element_type=x.dtype)    # (tile_n, 2*d_latent)
    k = kv[:, :d_latent]                                    # lane-aligned slices
    v = kv[:, d_latent:]

    # scores (num_latents, tile_n): contract the last axes of Q and K directly
    # (no K^T relayout).  1/sqrt(d_latent) and bq are pre-folded into q.
    s = lax.dot_general(q, k, dimension_numbers=(((1,), (1,)), ((), ())),
                        preferred_element_type=jnp.float32)
    if mask is not None:
        s = s + mask                 # additive (1, tile_n) row: 0 valid, -1e30 pad

    # Online softmax update across the sequence-tile grid axis (f32 math).
    m_prev = m_sc[...]
    m_new = jnp.maximum(m_prev, jnp.max(s, axis=-1, keepdims=True))
    alpha = jnp.exp(m_prev - m_new)
    p = jnp.exp(s - m_new)
    l_sc[...] = alpha * l_sc[...] + jnp.sum(p, axis=-1, keepdims=True)
    acc_sc[...] = alpha * acc_sc[...] + jnp.dot(
        p.astype(v.dtype), v, preferred_element_type=jnp.float32)
    m_sc[...] = m_new


def _xattn_kernel(d_latent, use_approx_recip, has_mask,
                  q_ref, wkv_ref, bv_ref, *rest):
    """Single-split path: grid = (B, n_tiles); normalized output written in-kernel."""
    if has_mask:
        mask_ref, x_ref, o_ref, m_sc, l_sc, acc_sc = rest
        mask = mask_ref[...]
    else:
        x_ref, o_ref, m_sc, l_sc, acc_sc = rest
        mask = None

    n_idx = pl.program_id(1)
    _online_softmax_step(n_idx, q_ref[...], wkv_ref[...], x_ref[0], mask,
                         d_latent, m_sc, l_sc, acc_sc)

    @pl.when(n_idx == pl.num_programs(1) - 1)
    def _finalize():
        acc = acc_sc[...]
        if use_approx_recip:
            out = acc * pl.reciprocal(l_sc[...], approx=True)   # EUP slot (bf16 path)
        else:
            out = acc / l_sc[...]                               # exact on the f32 path
        o_ref[0] = (out + bv_ref[...]).astype(o_ref.dtype)      # bv once, at the end


def _xattn_split_kernel(d_latent, has_mask, q_ref, wkv_ref, *rest):
    """Sequence-split path: grid = (B, seq_splits, tiles_per_split); emits
    per-split unnormalized partials (acc, m, l) for a wrapper-side combine."""
    if has_mask:
        mask_ref, x_ref, acc_out, m_out, l_out, m_sc, l_sc, acc_sc = rest
        mask = mask_ref[...]
    else:
        x_ref, acc_out, m_out, l_out, m_sc, l_sc, acc_sc = rest
        mask = None

    t_idx = pl.program_id(2)
    _online_softmax_step(t_idx, q_ref[...], wkv_ref[...], x_ref[0], mask,
                         d_latent, m_sc, l_sc, acc_sc)

    @pl.when(t_idx == pl.num_programs(2) - 1)
    def _finalize():
        acc_out[0, 0] = acc_sc[...]
        m_out[0, 0] = m_sc[...]
        l_out[0, 0] = l_sc[...]


def _const_spec(shape):
    zeros = (0,) * len(shape)
    return pl.BlockSpec(shape, lambda *_: zeros)


def perceiver_cross_attention(x, latents, wq, bq, wk, bk, wv, bv, *,
                              tile_n=None, seq_splits=1,
                              compute_dtype=jnp.bfloat16):
    """x: (B, N, d_model) -> (B, num_latents, d_latent).  num_heads == 1 path.

    tile_n:      sequence rows per grid step (default: min(1024, N)).  On v5e a
                 value of 256-512 is already enough to hide step overhead.
    seq_splits:  >1 splits the sequence reduction across an extra "parallel"
                 grid axis (keeps both v7x TensorCores busy at B=1) with a tiny
                 log-sum-exp combine in the wrapper.
    """
    B, N, d_model = x.shape
    num_latents, d_latent = latents.shape
    out_dtype = x.dtype
    f32 = jnp.float32
    seq_splits = max(1, int(seq_splits))
    # bk is added identically to every score of a latent row -> softmax is
    # shift-invariant per row -> dropping it is exact (up to fp rounding).
    del bk

    # --- Batch-invariant precompute (hoisted out of the kernel) ---------------
    scale = 1.0 / math.sqrt(d_latent)
    q_scaled = ((latents.astype(f32) @ wq.astype(f32)
                 + bq.reshape(1, -1).astype(f32)) * scale).astype(compute_dtype)

    wkv = jnp.concatenate([wk, wv], axis=1).astype(compute_dtype)  # (d_model, 2*d_latent)
    bv_row = bv.reshape(1, -1).astype(f32)                         # applied at finalize
    x_c = x.astype(compute_dtype)

    # --- Tile / padding policy -------------------------------------------------
    if tile_n is None:
        tile = min(1024, _round_up(N, 8))
    else:
        tile = min(max(8, _round_up(int(tile_n), 8)), _round_up(N, 8))
    n_tiles = _round_up(pl.cdiv(N, tile), seq_splits)
    if n_tiles > 1:
        # Multi-tile: keep the sequence tile lane-aligned so the (1, tile_n)
        # additive-mask block satisfies the (8, 128) layout rule.
        tile = _round_up(tile, 128)
        n_tiles = _round_up(pl.cdiv(N, tile), seq_splits)
    n_pad = n_tiles * tile

    if n_pad != N:
        x_c = jnp.pad(x_c, ((0, 0), (0, n_pad - N), (0, 0)))
    has_mask = n_pad != N
    if has_mask:
        col = jnp.arange(n_pad, dtype=jnp.int32)[None, :]
        mask_row = jnp.where(col < N, 0.0, _MASK_VALUE).astype(f32)  # (1, n_pad)

    # --- Cost hint for XLA scheduling around the custom call -------------------
    itemsize = jnp.dtype(compute_dtype).itemsize
    cost = pl.CostEstimate(
        flops=int(2 * B * n_pad * d_model * (2 * d_latent)
                  + 4 * B * n_pad * num_latents * d_latent),
        transcendentals=int(B * n_pad * num_latents),
        bytes_accessed=int(B * n_pad * d_model * itemsize
                           + d_model * 2 * d_latent * itemsize
                           + num_latents * d_latent * itemsize
                           + B * num_latents * d_latent
                           * jnp.dtype(out_dtype).itemsize),
    )

    scratch = [pltpu.VMEM((num_latents, 1), f32),          # running max
               pltpu.VMEM((num_latents, 1), f32),          # running denom
               pltpu.VMEM((num_latents, d_latent), f32)]   # output accumulator

    use_approx = jnp.dtype(compute_dtype) != jnp.dtype(jnp.float32)

    if seq_splits == 1:
        kernel = functools.partial(_xattn_kernel, d_latent, use_approx, has_mask)
        in_specs = [_const_spec((num_latents, d_latent)),          # Q (pre-scaled, +bq)
                    _const_spec((d_model, 2 * d_latent)),          # [Wk | Wv]
                    _const_spec((1, d_latent))]                    # bv
        inputs = [q_scaled, wkv, bv_row]
        if has_mask:
            in_specs.append(pl.BlockSpec((1, tile), lambda b, n: (0, n)))
            inputs.append(mask_row)
        in_specs.append(pl.BlockSpec((1, tile, d_model), lambda b, n: (b, n, 0)))
        inputs.append(x_c)

        return pl.pallas_call(
            kernel,
            out_shape=jax.ShapeDtypeStruct((B, num_latents, d_latent), out_dtype),
            grid_spec=pltpu.PrefetchScalarGridSpec(
                num_scalar_prefetch=0,
                grid=(B, n_tiles),
                in_specs=in_specs,
                out_specs=pl.BlockSpec((1, num_latents, d_latent),
                                       lambda b, n: (b, 0, 0)),
                scratch_shapes=scratch),
            compiler_params=pltpu.CompilerParams(
                dimension_semantics=("parallel", "arbitrary")),
            cost_estimate=cost,
        )(*inputs)

    # --- seq_splits > 1: flash-decoding style split over a parallel axis -------
    tiles_per_split = n_tiles // seq_splits
    kernel = functools.partial(_xattn_split_kernel, d_latent, has_mask)
    in_specs = [_const_spec((num_latents, d_latent)),
                _const_spec((d_model, 2 * d_latent))]
    inputs = [q_scaled, wkv]
    if has_mask:
        in_specs.append(pl.BlockSpec(
            (1, tile), lambda b, s, t: (0, s * tiles_per_split + t)))
        inputs.append(mask_row)
    in_specs.append(pl.BlockSpec(
        (1, tile, d_model), lambda b, s, t: (b, s * tiles_per_split + t, 0)))
    inputs.append(x_c)

    acc, m, l = pl.pallas_call(
        kernel,
        out_shape=(
            jax.ShapeDtypeStruct((B, seq_splits, num_latents, d_latent), f32),
            jax.ShapeDtypeStruct((B, seq_splits, num_latents, 1), f32),
            jax.ShapeDtypeStruct((B, seq_splits, num_latents, 1), f32)),
        grid_spec=pltpu.PrefetchScalarGridSpec(
            num_scalar_prefetch=0,
            grid=(B, seq_splits, tiles_per_split),
            in_specs=in_specs,
            out_specs=(
                pl.BlockSpec((1, 1, num_latents, d_latent),
                             lambda b, s, t: (b, s, 0, 0)),
                pl.BlockSpec((1, 1, num_latents, 1), lambda b, s, t: (b, s, 0, 0)),
                pl.BlockSpec((1, 1, num_latents, 1), lambda b, s, t: (b, s, 0, 0))),
            scratch_shapes=scratch),
        compiler_params=pltpu.CompilerParams(
            dimension_semantics=("parallel", "parallel", "arbitrary")),
        cost_estimate=cost,
    )(*inputs)

    # Tiny combine (f32).  A fully-padded split carries m = -1e30 and acc = 0,
    # so its weight exp(m - m_g) underflows to exactly 0 -> no NaN possible.
    m_g = jnp.max(m, axis=1, keepdims=True)
    w = jnp.exp(m - m_g)                                   # (B, S, L, 1)
    num = jnp.sum(w * acc, axis=1)                         # (B, L, D)
    den = jnp.sum(w * l, axis=1)                           # (B, L, 1)
    return (num / den + bv.reshape(1, 1, -1).astype(f32)).astype(out_dtype)


def _reference(x, latents, wq, bq, wk, bk, wv, bv):
    """Pure-JAX f32 reference mirroring the PyTorch forward (num_heads=1)."""
    B = x.shape[0]
    d_latent = latents.shape[-1]
    lat = jnp.broadcast_to(latents[None], (B,) + latents.shape)
    Q = lat @ wq + bq.reshape(1, -1)
    K = x @ wk + bk.reshape(1, -1)
    V = x @ wv + bv.reshape(1, -1)
    scores = jnp.einsum("bld,bnd->bln", Q, K) / math.sqrt(d_latent)
    attn = jax.nn.softmax(scores, axis=-1)
    return jnp.einsum("bln,bnd->bld", attn, V)


# TODO(synk): num_heads > 1 branch (head split + out_proj) is not implemented;
#             the module's default (num_heads=1) path is what this kernel covers.

if __name__ == "__main__":
    # Small deterministic config consistent with the module globals
    # (d_latent = gomme_boyutu = 384, num_latents = 64).
    B, N = 2, 300
    d_model = 128
    d_latent = 384
    num_latents = 64

    key = jax.random.PRNGKey(0)
    ks = jax.random.split(key, 8)

    latents = jax.random.normal(ks[0], (num_latents, d_latent), jnp.float32)
    # Linear weights stored as (in_features, out_features).
    wq = jax.random.normal(ks[1], (d_latent, d_latent), jnp.float32) * 0.05
    bq = jax.random.normal(ks[2], (d_latent,), jnp.float32) * 0.05
    wk = jax.random.normal(ks[3], (d_model, d_latent), jnp.float32) * 0.05
    bk = jax.random.normal(ks[4], (d_latent,), jnp.float32) * 0.05
    wv = jax.random.normal(ks[5], (d_model, d_latent), jnp.float32) * 0.05
    bv = jax.random.normal(ks[6], (d_latent,), jnp.float32) * 0.05
    x = jax.random.normal(ks[7], (B, N, d_model), jnp.float32)

    ref = _reference(x, latents, wq, bq, wk, bk, wv, bv)

    # 1) f32 path, forced multi-tile: exercises the online softmax across tiles
    #    and the padded-key mask, with exact reciprocal (semantics check).
    out_f32 = perceiver_cross_attention(x, latents, wq, bq, wk, bk, wv, bv,
                                        tile_n=128, compute_dtype=jnp.float32)
    out_f32 = jax.block_until_ready(out_f32)
    assert out_f32.shape == (B, num_latents, d_latent)
    assert jnp.allclose(out_f32, ref, atol=2e-3, rtol=2e-3), "f32 path mismatch"

    # 2) Default bf16 path, auto tile (whole padded sequence in one block).
    out_bf16 = perceiver_cross_attention(x, latents, wq, bq, wk, bk, wv, bv)
    out_bf16 = jax.block_until_ready(out_bf16)
    assert out_bf16.shape == (B, num_latents, d_latent)
    assert jnp.allclose(out_bf16, ref, atol=3e-2, rtol=3e-2), "bf16 path mismatch"

    # 3) bf16, B=1 with a 2-way sequence split (v7x two-TensorCore layout) and
    #    padding in the last split.
    out_split = perceiver_cross_attention(x[:1], latents, wq, bq, wk, bk, wv, bv,
                                          tile_n=128, seq_splits=2)
    out_split = jax.block_until_ready(out_split)
    assert out_split.shape == (1, num_latents, d_latent)
    assert jnp.allclose(out_split, ref[:1], atol=3e-2, rtol=3e-2), "split path mismatch"

    print("KERNEL_OK")
</pallas_src>

<mosaic_0001>
module attributes {stable_mosaic.version = 11 : i64} {
  func.func @_xattn_kernel(%arg0: i32, %arg1: i32, %arg2: memref<64x384xf32, #tpu.memory_space<vmem>>, %arg3: memref<128x768xf32, #tpu.memory_space<vmem>>, %arg4: memref<1x384xf32, #tpu.memory_space<vmem>>, %arg5: memref<1x128xf32, #tpu.memory_space<vmem>>, %arg6: memref<1x128x128xf32, #tpu.memory_space<vmem>>, %arg7: memref<1x64x384xf32, #tpu.memory_space<vmem>>, %arg8: memref<64x1xf32, #tpu.memory_space<vmem>>, %arg9: memref<64x1xf32, #tpu.memory_space<vmem>>, %arg10: memref<64x384xf32, #tpu.memory_space<vmem>>) attributes {dimension_semantics = [#tpu.dimension_semantics<parallel>, #tpu.dimension_semantics<arbitrary>], iteration_bounds = array<i64: 2, 3>, scalar_prefetch = 0 : i64, scratch_operands = 3 : i64, tpu.core_type = #tpu.core_type<tc>, window_params = [{pipeline_mode = #tpu.pipeline_mode<synchronous>, transform_indices = @transform_0, window_bounds = array<i64: 64, 384>}, {pipeline_mode = #tpu.pipeline_mode<synchronous>, transform_indices = @transform_1, window_bounds = array<i64: 128, 768>}, {pipeline_mode = #tpu.pipeline_mode<synchronous>, transform_indices = @transform_2, window_bounds = array<i64: 1, 384>}, {transform_indices = @transform_3, window_bounds = array<i64: 1, 128>}, {transform_indices = @transform_4, window_bounds = array<i64: 1, 128, 128>}, {transform_indices = @transform_5, window_bounds = array<i64: 1, 64, 384>}]} {
    %c0 = arith.constant 0 : index
    %c0_0 = arith.constant 0 : index
    %0 = vector.load %arg5[%c0, %c0_0] : memref<1x128xf32, #tpu.memory_space<vmem>>, vector<1x128xf32>
    %c0_1 = arith.constant 0 : index
    %c0_2 = arith.constant 0 : index
    %1 = vector.load %arg2[%c0_1, %c0_2] : memref<64x384xf32, #tpu.memory_space<vmem>>, vector<64x384xf32>
    %c0_3 = arith.constant 0 : index
    %c0_4 = arith.constant 0 : index
    %2 = vector.load %arg3[%c0_3, %c0_4] : memref<128x768xf32, #tpu.memory_space<vmem>>, vector<128x768xf32>
    %c0_5 = arith.constant 0 : index
    %c0_6 = arith.constant 0 : index
    %c0_7 = arith.constant 0 : index
    %3 = vector.load %arg6[%c0_5, %c0_6, %c0_7] : memref<1x128x128xf32, #tpu.memory_space<vmem>>, vector<1x128x128xf32>
    %4 = vector.shape_cast %3 : vector<1x128x128xf32> to vector<128x128xf32>
    %c0_i32 = arith.constant 0 : i32
    %5 = arith.cmpi eq, %arg1, %c0_i32 : i32
    %6 = arith.extui %5 : i1 to i32
    %c0_i32_8 = arith.constant 0 : i32
    %7 = arith.cmpi ne, %6, %c0_i32_8 : i32
    scf.if %7 {
      %cst_26 = arith.constant -1.000000e+30 : f32
      %39 = vector.broadcast %cst_26 : f32 to vector<64x1xf32>
      %c0_27 = arith.constant 0 : index
      %c0_28 = arith.constant 0 : index
      %40 = vector.load %arg8[%c0_27, %c0_28] : memref<64x1xf32, #tpu.memory_space<vmem>>, vector<64x1xf32>
      tpu.vector_store %arg8[%c0_27, %c0_28], %39 {strides = array<i32>} : memref<64x1xf32, #tpu.memory_space<vmem>>, vector<64x1xf32>,
      %cst_29 = arith.constant 0.000000e+00 : f32
      %41 = vector.broadcast %cst_29 : f32 to vector<64x1xf32>
      %c0_30 = arith.constant 0 : index
      %c0_31 = arith.constant 0 : index
      %42 = vector.load %arg9[%c0_30, %c0_31] : memref<64x1xf32, #tpu.memory_space<vmem>>, vector<64x1xf32>
      tpu.vector_store %arg9[%c0_30, %c0_31], %41 {strides = array<i32>} : memref<64x1xf32, #tpu.memory_space<vmem>>, vector<64x1xf32>,
      %cst_32 = arith.constant 0.000000e+00 : f32
      %43 = vector.broadcast %cst_32 : f32 to vector<64x384xf32>
      %c0_33 = arith.constant 0 : index
      %c0_34 = arith.constant 0 : index
      %44 = vector.load %arg10[%c0_33, %c0_34] : memref<64x384xf32, #tpu.memory_space<vmem>>, vector<64x384xf32>
      tpu.vector_store %arg10[%c0_33, %c0_34], %43 {strides = array<i32>} : memref<64x384xf32, #tpu.memory_space<vmem>>, vector<64x384xf32>,
    } else {
    }
    %cst = arith.constant dense<0.000000e+00> : vector<128x768xf32>
    %8 = tpu.matmul %4, %2, %cst {dimension_numbers = #tpu.dot_dimension_numbers<[1], [0], [0], [1], [0, 0, 1, 1], [], []>} : vector<128x128xf32>, vector<128x768xf32>, vector<128x768xf32> -> vector<128x768xf32>
    %9 = vector.extract_strided_slice %8 {offsets = [0, 0], sizes = [128, 384], strides = [1, 1]} : vector<128x768xf32> to vector<128x384xf32>
    %10 = vector.extract_strided_slice %8 {offsets = [0, 384], sizes = [128, 384], strides = [1, 1]} : vector<128x768xf32> to vector<128x384xf32>
    %cst_9 = arith.constant dense<0.000000e+00> : vector<64x128xf32>
    %11 = tpu.matmul %1, %9, %cst_9 {dimension_numbers = #tpu.dot_dimension_numbers<[1], [1], [0], [0], [0, 0, 1, 0], [], []>} : vector<64x384xf32>, vector<128x384xf32>, vector<64x128xf32> -> vector<64x128xf32>
    %12 = vector.broadcast %0 : vector<1x128xf32> to vector<64x128xf32>
    %13 = arith.addf %11, %12 : vector<64x128xf32>
    %c0_10 = arith.constant 0 : index
    %c0_11 = arith.constant 0 : index
    %14 = vector.load %arg8[%c0_10, %c0_11] : memref<64x1xf32, #tpu.memory_space<vmem>>, vector<64x1xf32>
    %cst_12 = arith.constant dense<0xFF800000> : vector<64xf32>
    %15 = vector.multi_reduction <maximumf>, %13, %cst_12 [1] : vector<64x128xf32> to vector<64xf32>
    %16 = vector.shape_cast %15 : vector<64xf32> to vector<64x1xf32>
    %17 = arith.maximumf %14, %16 : vector<64x1xf32>
    %18 = arith.subf %14, %17 : vector<64x1xf32>
    %19 = math.exp %18 : vector<64x1xf32>
    %20 = vector.broadcast %17 : vector<64x1xf32> to vector<64x128xf32>
    %21 = arith.subf %13, %20 : vector<64x128xf32>
    %22 = math.exp %21 : vector<64x128xf32>
    %c0_13 = arith.constant 0 : index
    %c0_14 = arith.constant 0 : index
    %23 = vector.load %arg9[%c0_13, %c0_14] : memref<64x1xf32, #tpu.memory_space<vmem>>, vector<64x1xf32>
    %24 = arith.mulf %19, %23 : vector<64x1xf32>
    %cst_15 = arith.constant dense<0.000000e+00> : vector<64xf32>
    %25 = vector.multi_reduction <add>, %22, %cst_15 [1] : vector<64x128xf32> to vector<64xf32>
    %26 = vector.shape_cast %25 : vector<64xf32> to vector<64x1xf32>
    %27 = arith.addf %24, %26 : vector<64x1xf32>
    %c0_16 = arith.constant 0 : index
    %c0_17 = arith.constant 0 : index
    %28 = vector.load %arg9[%c0_16, %c0_17] : memref<64x1xf32, #tpu.memory_space<vmem>>, vector<64x1xf32>
    tpu.vector_store %arg9[%c0_16, %c0_17], %27 {strides = array<i32>} : memref<64x1xf32, #tpu.memory_space<vmem>>, vector<64x1xf32>,
    %c0_18 = arith.constant 0 : index
    %c0_19 = arith.constant 0 : index
    %29 = vector.load %arg10[%c0_18, %c0_19] : memref<64x384xf32, #tpu.memory_space<vmem>>, vector<64x384xf32>
    %30 = vector.broadcast %19 : vector<64x1xf32> to vector<64x384xf32>
    %31 = arith.mulf %30, %29 : vector<64x384xf32>
    %cst_20 = arith.constant dense<0.000000e+00> : vector<64x384xf32>
    %32 = tpu.matmul %22, %10, %cst_20 {dimension_numbers = #tpu.dot_dimension_numbers<[1], [0], [0], [1], [0, 0, 1, 1], [], []>} : vector<64x128xf32>, vector<128x384xf32>, vector<64x384xf32> -> vector<64x384xf32>
    %33 = arith.addf %31, %32 : vector<64x384xf32>
    %c0_21 = arith.constant 0 : index
    %c0_22 = arith.constant 0 : index
    %34 = vector.load %arg10[%c0_21, %c0_22] : memref<64x384xf32, #tpu.memory_space<vmem>>, vector<64x384xf32>
    tpu.vector_store %arg10[%c0_21, %c0_22], %33 {strides = array<i32>} : memref<64x384xf32, #tpu.memory_space<vmem>>, vector<64x384xf32>,
    %c0_23 = arith.constant 0 : index
    %c0_24 = arith.constant 0 : index
    %35 = vector.load %arg8[%c0_23, %c0_24] : memref<64x1xf32, #tpu.memory_space<vmem>>, vector<64x1xf32>
    tpu.vector_store %arg8[%c0_23, %c0_24], %17 {strides = array<i32>} : memref<64x1xf32, #tpu.memory_space<vmem>>, vector<64x1xf32>,
    %c2_i32 = arith.constant 2 : i32
    %36 = arith.cmpi eq, %arg1, %c2_i32 : i32
    %37 = arith.extui %36 : i1 to i32
    %c0_i32_25 = arith.constant 0 : i32
    %38 = arith.cmpi ne, %37, %c0_i32_25 : i32
    scf.if %38 {
      %c0_26 = arith.constant 0 : index
      %c0_27 = arith.constant 0 : index
      %39 = vector.load %arg10[%c0_26, %c0_27] : memref<64x384xf32, #tpu.memory_space<vmem>>, vector<64x384xf32>
      %c0_28 = arith.constant 0 : index
      %c0_29 = arith.constant 0 : index
      %40 = vector.load %arg9[%c0_28, %c0_29] : memref<64x1xf32, #tpu.memory_space<vmem>>, vector<64x1xf32>
      %41 = vector.broadcast %40 : vector<64x1xf32> to vector<64x384xf32>
      %42 = arith.divf %39, %41 : vector<64x384xf32>
      %c0_30 = arith.constant 0 : index
      %c0_31 = arith.constant 0 : index
      %43 = vector.load %arg4[%c0_30, %c0_31] : memref<1x384xf32, #tpu.memory_space<vmem>>, vector<1x384xf32>
      %44 = vector.broadcast %43 : vector<1x384xf32> to vector<64x384xf32>
      %45 = arith.addf %42, %44 : vector<64x384xf32>
      %c0_32 = arith.constant 0 : index
      %c0_33 = arith.constant 0 : index
      %c0_34 = arith.constant 0 : index
      %46 = vector.load %arg7[%c0_32, %c0_33, %c0_34] : memref<1x64x384xf32, #tpu.memory_space<vmem>>, vector<1x64x384xf32>
      %47 = vector.shape_cast %46 : vector<1x64x384xf32> to vector<64x384xf32>
      %48 = vector.shape_cast %45 : vector<64x384xf32> to vector<1x64x384xf32>
      tpu.vector_store %arg7[%c0_32, %c0_33, %c0_34], %48 {strides = array<i32>} : memref<1x64x384xf32, #tpu.memory_space<vmem>>, vector<1x64x384xf32>,
    } else {
    }
    return
  }
  func.func @transform_0(%arg0: i32, %arg1: i32) -> (i32, i32) {
    %c0_i32 = arith.constant 0 : i32
    %c0_i32_0 = arith.constant 0 : i32
    %c0_i32_1 = arith.constant 0 : i32
    return %c0_i32, %c0_i32_0 : i32, i32
  }
  func.func @transform_1(%arg0: i32, %arg1: i32) -> (i32, i32) {
    %c0_i32 = arith.constant 0 : i32
    %c0_i32_0 = arith.constant 0 : i32
    %c0_i32_1 = arith.constant 0 : i32
    return %c0_i32, %c0_i32_0 : i32, i32
  }
  func.func @transform_2(%arg0: i32, %arg1: i32) -> (i32, i32) {
    %c0_i32 = arith.constant 0 : i32
    %c0_i32_0 = arith.constant 0 : i32
    %c0_i32_1 = arith.constant 0 : i32
    return %c0_i32, %c0_i32_0 : i32, i32
  }
  func.func @transform_3(%arg0: i32, %arg1: i32) -> (i32, i32) {
    %c0_i32 = arith.constant 0 : i32
    %c0_i32_0 = arith.constant 0 : i32
    return %c0_i32, %arg1 : i32, i32
  }
  func.func @transform_4(%arg0: i32, %arg1: i32) -> (i32, i32, i32) {
    %c0_i32 = arith.constant 0 : i32
    %c0_i32_0 = arith.constant 0 : i32
    return %arg0, %arg1, %c0_i32 : i32, i32, i32
  }
  func.func @transform_5(%arg0: i32, %arg1: i32) -> (i32, i32, i32) {
    %c0_i32 = arith.constant 0 : i32
    %c0_i32_0 = arith.constant 0 : i32
    %c0_i32_1 = arith.constant 0 : i32
    return %arg0, %c0_i32, %c0_i32_0 : i32, i32, i32
  }
}

</mosaic_0001>

<bundles_post_ra>
// kernel: tpu_custom_call.1
= control target key start
LH: loop header
LB: loop body
LE: loop exit
PB: predicated region body
PF: predicated region fallthrough
CT: control target
= control target key end

     0   :  { %s4018_s0 = inlined_call_operand.hbm [shape: f32[64,384], index: 0, kind: input, shape index: {}]   ;;  %s4019_s1 = inlined_call_operand.hbm [shape: f32[128,768], index: 1, kind: input, shape index: {}]   ;;  %s4020_s2 = inlined_call_operand.vmem [shape: f32[1,384], index: 2, kind: input, shape index: {}]   ;;  %s4021_s3 = inlined_call_operand.hbm [shape: f32[1,384], index: 3, kind: input, shape index: {}]   ;;  %s4022_s4 = inlined_call_operand.hbm [shape: f32[2,384,128], index: 4, kind: input, shape index: {}]   ;;  %s4023_s5 = inlined_call_operand.hbm [shape: f32[2,64,384], index: 5, kind: output, shape index: {}]  }
   0x1   :  { %4051 = sst [smem:[#allocation105_spill]] %s4018_s0 }
   0x2   :  { %4052 = sst [smem:[#allocation106_spill]] %s4020_s2 }
   0x3   :  { %4053 = sst [smem:[#allocation107_spill]] %s4021_s3 }
   0x4   :  { %4054 = sst [smem:[#allocation108_spill]] %s4023_s5 }
   0x5   :  { %10 = vsyncpa [#allocation6], 0 }
   0x6   :  { %11 = vsyncpa [#allocation9], 0 }
   0x7   :  { %12 = vsyncpa [#allocation7], 0 }
   0x8   :  { %14 = vsyncpa [#allocation7 + $0x1], 0  ;;  %s2730_s18 = smov 0   ;;  %s2732_s19 = smov 0  }
   0x9   :  { %s2734_s20 = smov 0   ;;  %s2736_s21 = smov 0  }
   0xa   :  { %s2738_s22 = smov 0   ;;  %s2740_s23 = smov 0  }
   0xb   :  { %s2742_s24 = smov 0   ;;  %s2744_s25 = smov 0  }
   0xc   :  { %s2746_s26 = smov 0   ;;  %s2748_s27 = smov 0  }
   0xd   :  { %s2750_s28 = smov 0   ;;  %s2752_s29 = smov 0  }
   0xe   :  { %s2754_s30 = smov 0   ;;  %s2756_s6 = smov 0  }
   0xf LB: > { %4055 = sst [smem:[#allocation18_spill]] %s2628_s18  ;;  %s2799_s7 = sadd.s32 4294967295, %s2680_s6   ;;  %s2680_s6 = sphi %s2756_s6, %s20_s6   ;;  %s2676_s30 = sphi %s2754_s30, %s4263_s30   ;;  %s2672_s29 = sphi %s2752_s29, %s4272_s29   ;;  %s2668_s28 = sphi %s2750_s28, %s4261_s28   ;;  %s2664_s27 = sphi %s2748_s27, %s4260_s27   ;;  %s2660_s26 = sphi %s2746_s26, %s4259_s26   ;;  %s2656_s25 = sphi %s2744_s25, %s4271_s25   ;;  %s2652_s24 = sphi %s2742_s24, %s4270_s24   ;;  %s2648_s23 = sphi %s2740_s23, %s4269_s23   ;;  %s2644_s22 = sphi %s2738_s22, %s4268_s22   ;;  %s2640_s21 = sphi %s2736_s21, %s4267_s21   ;;  %s2636_s20 = sphi %s2734_s20, %s4266_s20   ;;  %s2632_s19 = sphi %s2732_s19, %s4265_s19   ;;  %s2628_s18 = sphi %s2730_s18, %s4257_s18  }
  0x10   : > { %4056 = sst [smem:[#allocation19_spill]] %s2632_s19  ;;  %s2041_s8 = sadd.s32 4294967294, %s2680_s6  }
  0x11   : > { %4057 = sst [smem:[#allocation20_spill]] %s2660_s26  ;;  %p4036_p0 = scmp.eq.s32.totalorder %s2799_s7, 0 }
  0x12   : > { %4058 = sst [smem:[#allocation21_spill]] %s2664_s27  ;;  %p143_p1 = scmp.ne.s32.totalorder %s2644_s22, %s2640_s21 }
  0x13   : > { %4059 = sst [smem:[#allocation22_spill]] %s2668_s28  ;;  %p166_p2 = scmp.ne.s32.totalorder %s2636_s20, %s2632_s19 }
  0x14   : > { %4060 = sst [smem:[#allocation23_spill]] %s2672_s29  ;;  %p167_p3 = scmp.eq.s32.totalorder %s2799_s7, 5 }
  0x15   : > { %4061 = sst [smem:[#allocation24_spill]] %s2676_s30  ;;  %p2809_p4 = por %p143_p1, %p4036_p0 }
  0x16   : > { %p172_p5 = scmp.ne.s32.totalorder %s2632_s19, %s2628_s18  ;;  %p2815_p6 = por %p167_p3, %p166_p2 }
  0x17   : > { %s4062_s9 = scalar_select %p2809_p4, 1, 0 }
  0x18   : > { %s4063_s10 = scalar_select %p2815_p6, 1, 0 }
  0x19   : > { %p173_p7 = scmp.eq.s32.totalorder %s2041_s8, 5  ;;  %p2042_p8 = scmp.ge.s32.totalorder %s2680_s6, 1 }
  0x1a   : > { %4064 = sst [smem:[#allocation25_spill]] %s4063_s10  ;;  %p180_p9 = scmp.lt.s32.totalorder %s2680_s6, 7 }
  0x1b   : > { %p2821_p10 = por %p173_p7, %p172_p5  ;;  %s2682_s13 = smov [#allocation5]  }
  0x1c   : > { %p2825_p11 = pnand %p2042_p8, %p180_p9  ;;  %s192_s14 = sshll.u32 %s2682_s13, 4  ;;  %s193_s14 = int_to_ptr.vmem [resolvable:$true] %s192_s14 }
  0x1d   : > { %s4065_s11 = scalar_select %p2821_p10, 1, 0 }
  0x1e   : > { %p2213_p12 = pneg %p2825_p11  ;;  %s2427_s16 = scalar_lea.vmem %s193_s14, 3072 }
  0x1f   : > { %4066 = sst [smem:[#allocation26_spill]] %s4065_s11  ;;  %p2428_p2 = scmp.ne.s32.totalorder %s193_s14, %s2427_s16 }
  0x20   : > { %p2833_p13 = pnand %p2213_p12, %p4036_p0  ;;  %p2435_p7 = scmp.lt.s32.totalorder %s193_s14, %s193_s14 }
  0x21   : > { %p2436_p8 = scmp.lt.s32.totalorder %s2427_s16, %s2427_s16 }
  0x22   : > { %p4027_p1 = pneg %p2833_p13 }
  0x23   : > { %p2437_p9 = por %p2436_p8, %p2435_p7 }
  0x24   : > { %p2430_p3 = pnand %p2428_p2, %p4027_p1 }
  0x26   : > { %p2431_p5 = pneg %p2430_p3 }
  0x28   : > { %p2438_p10 = pnand %p2437_p9, %p2431_p5 }
  0x2a   : > { %2441 = shalt.err (!%p2438_p10)
}
  0x2b   : > { %s2683_s17 = smov 384   ;;  %s2684_s21 = smov 24  }
  0x2c   : > { %s4069_s0 = sld [smem:[#allocation105_spill]]  ;;  %s29_s16 = sadd.s32 1, %s2672_s29 }
  0x2d   : > { %s32_s11 = sadd.s32 1, %s2676_s30  ;;  %p30_p10 = scmp.ge.s32.totalorder %s29_s16, 3 }
  0x2e   : > { %s102_s18 = sadd.s32 1, %s2660_s26  ;;  %p109_p12 = scmp.ne.s32.totalorder %s2660_s26, %s2656_s25 }
  0x2f   : > { %p110_p2 = scmp.eq.s32.totalorder %s2680_s6, 0  ;;  %s4274_s16 = smov (%p30_p10, %s29_s16), 0 }
  0x30   : > { %4070 = sst [smem:[#allocation27_spill]] %s4274_s16  ;;  %s4276_s11 = smov (!%p30_p10, %s32_s11), %s2676_s30 }
  0x31   : > { %s99_s5 = ssub.s32 %s2672_s29, %s4274_s16  ;;  %p2860_p3 = por %p110_p2, %p109_p12 }
  0x32   : > { %2216 = dma.hbm_to_vmem [thread:$0]  (!%p2833_p13), %s4069_s0, 3072, %s193_s14, [#allocation6], %s2683_s17, %s2683_s17, %s2684_s21  }
  0x33   : > { %p34_p5 = scmp.ge.s32.totalorder %s4276_s11, 2  ;;  %p100_p7 = scmp.eq.s32.totalorder %s99_s5, 0 }
  0x34   : > { %p115_p8 = scmp.ne.s32.totalorder %s2656_s25, %s2652_s24  ;;  %s130_s17 = sadd.s32 1, %s2648_s23 }
  0x35   : > { %s4278_s11 = smov (%p34_p5, %s4276_s11), 0  ;;  %p137_p10 = scmp.ne.s32.totalorder %s2648_s23, %s2644_s22 }
  0x36   : > { %4072 = sst [smem:[#allocation28_spill]] %s4278_s11  ;;  %p2874_p9 = por %p4036_p0, %p115_p8 }
  0x37   : > { %s2870_s21 = scalar_select %p100_p7, %s2660_s26, %s102_s18  }
  0x38   : > { %s4074_s8 = scalar_select %p2874_p9, 1, 0 }
  0x39   : > { %4073 = sst [smem:[#allocation29_spill]] %s2870_s21  ;;  %s125_s13 = ssub.s32 %s2676_s30, %s4278_s11 }
  0x3a   : > { %s127_s0 = sor.u32 %s125_s13, %s99_s5  ;;  %p154_p1 = scmp.eq.s32.totalorder %s125_s13, 0 }
  0x3b   : > { %p128_p12 = scmp.eq.s32.totalorder %s127_s0, 0  ;;  %p2884_p6 = por %p137_p10, %p110_p2 }
  0x3c   : > { %s156_s18 = sadd.s32 1, %s2636_s20  ;;  %p2233_p5 = scmp.lt.s32.totalorder %s2680_s6, 6 }
  0x3d   : > { %s2890_s16 = scalar_select %p128_p12, %s2648_s23, %s130_s17  }
  0x3e   : > { %s2893_s21 = scalar_select %p154_p1, %s2636_s20, %s156_s18  }
  0x3f   : > { %s222_s10 = sand.u32 1, %s2680_s6   ;;  %s224_s11 = sand.u32 1, %s2660_s26  }
  0x40   : > { %s2046_s5 = sshll.u32 %s2672_s29, 4  ;;  %s4076_s3 = sld [smem:[#allocation107_spill]] }
  0x41   : > { %s225_s13 = scalar_lea.vmem [#allocation10], %s224_s11  ;;  %p2904_p2 = pnand %p2233_p5, %p2860_p3 }
  0x42   : > { %s232_s27 = sshll.u32 %s225_s13, 4  ;;  %s2196_s17 = smul.u32 48, %s2676_s30  ;;  %s233_s27 = int_to_ptr.vmem [resolvable:$true] %s232_s27 }
  0x43   : > { %p2911_p1 = pnand %p2233_p5, %p2884_p6  ;;  %s2915_s29 = scalar_lea.sflag [#allocation6], %s222_s10 }
  0x44   : > { %p2444_p7 = pneg %p2904_p2  ;;  %s2455_s2 = scalar_lea.vmem %s233_s27, 16 }
  0x45   : > { %p2456_p8 = scmp.ne.s32.totalorder %s233_s27, %s2455_s2  ;;  %s2685_s28 = smov [#allocation10]  }
  0x46   : > { %s230_s0 = scalar_lea.hbm %s4076_s3, %s2046_s5  ;;  %s2460_s11 = sshll.u32 %s2685_s28, 4  ;;  %s2461_s11 = int_to_ptr.vmem [resolvable:$false] %s2460_s11 }
  0x47   : > { %p2458_p10 = pnand %p2456_p8, %p2444_p7  ;;  %s2462_s14 = scalar_lea.vmem %s2461_s11, 32 }
  0x48   : > { %p2463_p3 = scmp.lt.s32.totalorder %s233_s27, %s2461_s11  ;;  %p2464_p0 = scmp.lt.s32.totalorder %s2462_s14, %s2455_s2 }
  0x49   : > { %p2459_p12 = pneg %p2458_p10 }
  0x4a   : > { %p2465_p4 = por %p2464_p0, %p2463_p3 }
  0x4c   : > { %p2466_p9 = pnand %p2465_p4, %p2459_p12 }
  0x4e   : > { %2469 = shalt.err (!%p2466_p9)
}
  0x4f   : > { %2223 = dma.hbm_to_vmem [thread:$0]  (!%p2904_p2), %s230_s0, 16, %s233_s27, %s2915_s29  }
  0x50   : > { %s249_s10 = sadd.s32 %s2196_s17, %s2046_s5  ;;  %s2686_s24 = smov [#allocation8]  }
  0x51   : > { %s205_s13 = sshll.u32 %s2686_s24, 4  ;;  %s2049_s3 = sshll.u32 %s249_s10, 7  ;;  %s206_s13 = int_to_ptr.vmem [resolvable:$true] %s205_s13 }
  0x52   : > { %s2481_s30 = scalar_lea.vmem %s206_s13, 12288  ;;  %p4079_p5 = pneg %p2833_p13 }
  0x53   : > { %p2482_p6 = scmp.ne.s32.totalorder %s206_s13, %s2481_s30  ;;  %p2489_p10 = scmp.lt.s32.totalorder %s206_s13, %s206_s13 }
  0x54   : > { %p2490_p0 = scmp.lt.s32.totalorder %s2481_s30, %s2481_s30 }
  0x55   : > { %p2484_p7 = pnand %p2482_p6, %p4079_p5 }
  0x56   : > { %p2491_p4 = por %p2490_p0, %p2489_p10 }
  0x57   : > { %p2485_p8 = pneg %p2484_p7 }
  0x59   : > { %p2492_p9 = pnand %p2491_p4, %p2485_p8 }
  0x5b   : > { %2495 = shalt.err (!%p2492_p9)
}
  0x5c   : > { %s2687_s19 = smov 768   ;;  %s2688_s27 = smov 48  }
  0x5d   : > { %2219 = dma.hbm_to_vmem [thread:$0]  (!%p2833_p13), %s4019_s1, 12288, %s206_s13, [#allocation9], %s2687_s19, %s2687_s19, %s2688_s27  }
  0x5e   : > { %s251_s28 = scalar_lea.hbm %s4022_s4, %s2049_s3  ;;  %s241_s11 = sand.u32 1, %s2648_s23  }
  0x5f   : > { %s2047_s14 = sshll.u32 %s241_s11, 7  ;;  %p2498_p2 = pneg %p2911_p1 }
  0x60   : > { %s243_s30 = scalar_lea.vmem [#allocation11], %s2047_s14  ;;  %s2689_s15 = smov [#allocation11]  }
  0x61   : > { %s252_s10 = sshll.u32 %s243_s30, 4  ;;  %s2514_s26 = sshll.u32 %s2689_s15, 4  ;;  %s253_s10 = int_to_ptr.vmem [resolvable:$true] %s252_s10  ;;  %s2515_s26 = int_to_ptr.vmem [resolvable:$false] %s2514_s26 }
  0x62   : > { %s2509_s24 = scalar_lea.vmem %s253_s10, 2048  ;;  %s2516_s5 = scalar_lea.vmem %s2515_s26, 4096 }
  0x63   : > { %p2510_p12 = scmp.ne.s32.totalorder %s253_s10, %s2509_s24  ;;  %p2517_p13 = scmp.lt.s32.totalorder %s253_s10, %s2515_s26 }
  0x64   : > { %p2518_p5 = scmp.lt.s32.totalorder %s2516_s5, %s2509_s24 }
  0x65   : > { %p2512_p3 = pnand %p2510_p12, %p2498_p2 }
  0x66   : > { %p2519_p7 = por %p2518_p5, %p2517_p13 }
  0x67   : > { %p2513_p6 = pneg %p2512_p3 }
  0x69   : > { %p2520_p8 = pnand %p2519_p7, %p2513_p6 }
  0x6b   : > { %2523 = shalt.err (!%p2520_p8)
}
  0x6c   : > { %s2690_s3 = smov 128   ;;  %s2691_s13 = smov 8  }
  0x6d   : > { %2226 = dma.hbm_to_vmem [thread:$0]  (!%p2911_p1), %s251_s28, 2048, %s253_s10, %s2915_s29, %s2690_s3, %s2690_s3, %s2691_s13  }
  0x6e   : > { %264 = sbr.rel (%p2825_p11) target bundleno = 1468 (0x5bc), region = 40 }
  0x73   : > { %p4080_p10 = scmp.eq.s32.totalorder %s2799_s7, 0 }
  0x75   : > { %2607 = dma.done.wait (%p4080_p10), [#allocation6], 3072   ;;  %p4081_p0 = pmov %p4080_p10 }
  0x77   : > { %2609 = vsyncadd (%p4081_p0), [#allocation6], 4294964224  ;;  %p4082_p4 = pmov %p4081_p0 }
  0x78   : > { %p4083_p9 = pmov %p4081_p0 }
  0x79   : > { %2611 = dma.done.wait (%p4082_p4), [#allocation9], 12288  }
  0x7a   : > { %2613 = vsyncadd (%p4083_p9), [#allocation9], 4294955008  ;;  %s274_s26 = sand.u32 1, %s2799_s7   ;;  %s276_s29 = sand.u32 1, %s2656_s25  }
  0x7b   : > { %s275_s18 = scalar_lea.sflag [#allocation6], %s274_s26  ;;  %s277_s12 = scalar_lea.vmem [#allocation10], %s276_s29 }
  0x7c   : > { %p4084_p11 = scmp.ne.s32.totalorder %s4074_s8, 0 }
  0x7e   : > { %2615 = dma.done.wait (%p4084_p11), %s275_s18, 16  }
  0x7f   : > { %2617 = vsyncadd (%p4084_p11), %s275_s18, 4294967280  ;;  %s284_s19 = sand.u32 1, %s2644_s22   ;;  %p4085_p1 = scmp.ne.s32.totalorder %s4062_s9, 0 }
  0x80   : > { %s2053_s27 = sshll.u32 %s284_s19, 7 }
  0x81   : > { %s2956_s0 = scalar_lea.vmem [#allocation11], %s2053_s27 }
  0x82   : > { %2619 = dma.done.wait (%p4085_p1), %s275_s18, 2048  }
  0x83   : > { %2621 = vsyncadd (%p4085_p1), %s275_s18, 4294965248  ;;  %s4086_s7 = sld [smem:[#allocation19_spill]]  ;;  %v2967_v0 = vld [vmem:[%s277_s12] ss:$0 sm:$0xff]  ;;  %v2971_v2 = vld [vmem:[#allocation5 + $0x8] sm:$0xff] }
  0x84   : > { %4087 = vst [vmem:[#allocation30_spill] sm:$0xff] %v2967_v0  ;;  %v2969_v1 = vld [vmem:[#allocation5] sm:$0xff]  ;;  %4089 = vst [vmem:[#allocation32_spill] sm:$0xff] %v2971_v2  ;;  %v2973_v3 = vld [vmem:[#allocation5 + $0x10] sm:$0xff]  ;;  %s4162_s8 = sld [smem:[#allocation21_spill]] }
  0x85   : > { %4088 = vst [vmem:[#allocation31_spill] sm:$0xff] %v2969_v1  ;;  %4090 = vst [vmem:[#allocation33_spill] sm:$0xff] %v2973_v3  ;;  %v2975_v4 = vld [vmem:[#allocation5 + $0x18] sm:$0xff]  ;;  %v2977_v5 = vld [vmem:[#allocation5 + $0x20] sm:$0xff] }
  0x86   : > { %4091 = vst [vmem:[#allocation34_spill] sm:$0xff] %v2975_v4  ;;  %4092 = vst [vmem:[#allocation35_spill] sm:$0xff] %v2977_v5  ;;  %v2979_v6 = vld [vmem:[#allocation5 + $0x28] sm:$0xff]  ;;  %v2981_v7 = vld [vmem:[#allocation5 + $0x30] sm:$0xff] }
  0x87   : > { %4093 = vst [vmem:[#allocation36_spill] sm:$0xff] %v2979_v6  ;;  %4094 = vst [vmem:[#allocation37_spill] sm:$0xff] %v2981_v7  ;;  %v2983_v8 = vld [vmem:[#allocation5 + $0x38] sm:$0xff]  ;;  %v2985_v9 = vld [vmem:[#allocation5 + $0x40] sm:$0xff] }
  0x88   : > { %4095 = vst [vmem:[#allocation38_spill] sm:$0xff] %v2983_v8  ;;  %4096 = vst [vmem:[#allocation39_spill] sm:$0xff] %v2985_v9  ;;  %v2987_v10 = vld [vmem:[#allocation5 + $0x48] sm:$0xff]  ;;  %v2989_v11 = vld [vmem:[#allocation5 + $0x50] sm:$0xff] }
  0x89   : > { %s314_s17 = sand.u32 1, %s4086_s7   ;;  %4097 = vst [vmem:[#allocation40_spill] sm:$0xff] %v2987_v10  ;;  %4098 = vst [vmem:[#allocation41_spill] sm:$0xff] %v2989_v11  ;;  %v2991_v12 = vld [vmem:[#allocation5 + $0x58] sm:$0xff]  ;;  %v2993_v13 = vld [vmem:[#allocation5 + $0x60] sm:$0xff] }
  0x8a   : > { %s2965_s2 = smul.u32 192, %s314_s17  ;;  %4099 = vst [vmem:[#allocation42_spill] sm:$0xff] %v2991_v12  ;;  %4100 = vst [vmem:[#allocation43_spill] sm:$0xff] %v2993_v13  ;;  %v2995_v14 = vld [vmem:[#allocation5 + $0x68] sm:$0xff]  ;;  %v2997_v15 = vld [vmem:[#allocation5 + $0x70] sm:$0xff]  ;;  %p2054_p2 = scmp.ne.s32.totalorder %s4162_s8, 0 }
  0x8b   : > { %4101 = vst [vmem:[#allocation44_spill] sm:$0xff] %v2995_v14  ;;  %4102 = vst [vmem:[#allocation45_spill] sm:$0xff] %v2997_v15  ;;  %v2999_v16 = vld [vmem:[#allocation5 + $0x78] sm:$0xff]  ;;  %v3001_v17 = vld [vmem:[#allocation5 + $0x80] sm:$0xff] }
  0x8c   : > { %4103 = vst [vmem:[#allocation46_spill] sm:$0xff] %v2999_v16  ;;  %4104 = vst [vmem:[#allocation47_spill] sm:$0xff] %v3001_v17  ;;  %v3003_v18 = vld [vmem:[#allocation5 + $0x88] sm:$0xff]  ;;  %v3005_v19 = vld [vmem:[#allocation5 + $0x90] sm:$0xff]  ;;  %s3258_s9 = scalar_lea.vmem [#allocation12], %s2965_s2 }
  0x8d   : > { %4105 = vst [vmem:[#allocation48_spill] sm:$0xff] %v3003_v18  ;;  %4106 = vst [vmem:[#allocation49_spill] sm:$0xff] %v3005_v19  ;;  %v3007_v20 = vld [vmem:[#allocation5 + $0x98] sm:$0xff]  ;;  %v3009_v21 = vld [vmem:[#allocation5 + $0xa0] sm:$0xff] }
  0x8e   : > { %4107 = vst [vmem:[#allocation50_spill] sm:$0xff] %v3007_v20  ;;  %4108 = vst [vmem:[#allocation51_spill] sm:$0xff] %v3009_v21  ;;  %v3011_v22 = vld [vmem:[#allocation5 + $0xa8] sm:$0xff]  ;;  %v3013_v23 = vld [vmem:[#allocation5 + $0xb0] sm:$0xff] }
  0x8f   : > { %4109 = vst [vmem:[#allocation52_spill] sm:$0xff] %v3011_v22  ;;  %4110 = vst [vmem:[#allocation53_spill] sm:$0xff] %v3013_v23  ;;  %v3015_v24 = vld [vmem:[#allocation5 + $0xb8] sm:$0xff]  ;;  %v3017_v25 = vld [vmem:[#allocation8] sm:$0xff] }
  0x90   : > { %4111 = vst [vmem:[#allocation54_spill] sm:$0xff] %v3015_v24  ;;  %4112 = vst [vmem:[#allocation55_spill] sm:$0xff] %v3017_v25  ;;  %v3019_v26 = vld [vmem:[#allocation8 + $0x8] sm:$0xff]  ;;  %v3021_v27 = vld [vmem:[#allocation8 + $0x10] sm:$0xff] }
  0x91   : > { %4113 = vst [vmem:[#allocation56_spill] sm:$0xff] %v3019_v26  ;;  %4114 = vst [vmem:[#allocation57_spill] sm:$0xff] %v3021_v27  ;;  %v3023_v28 = vld [vmem:[#allocation8 + $0x18] sm:$0xff]  ;;  %v3025_v29 = vld [vmem:[#allocation8 + $0x20] sm:$0xff] }
  0x92   : > { %4115 = vst [vmem:[#allocation58_spill] sm:$0xff] %v3023_v28  ;;  %4116 = vst [vmem:[#allocation59_spill] sm:$0xff] %v3025_v29  ;;  %v3027_v30 = vld [vmem:[#allocation8 + $0x28] sm:$0xff]  ;;  %v3029_v31 = vld [vmem:[#allocation8 + $0x30] sm:$0xff] }
  0x93   : > { %4117 = vst [vmem:[#allocation60_spill] sm:$0xff] %v3027_v30  ;;  %4118 = vst [vmem:[#allocation61_spill] sm:$0xff] %v3029_v31  ;;  %v3031_v32 = vld [vmem:[#allocation8 + $0x38] sm:$0xff]  ;;  %v3033_v33 = vld [vmem:[#allocation8 + $0x40] sm:$0xff] }
  0x94   : > { %4119 = vst [vmem:[#allocation62_spill] sm:$0xff] %v3031_v32  ;;  %4120 = vst [vmem:[#allocation63_spill] sm:$0xff] %v3033_v33  ;;  %v3035_v34 = vld [vmem:[#allocation8 + $0x48] sm:$0xff]  ;;  %v3037_v35 = vld [vmem:[#allocation8 + $0x50] sm:$0xff] }
  0x95   : > { %4121 = vst [vmem:[#allocation64_spill] sm:$0xff] %v3035_v34  ;;  %4122 = vst [vmem:[#allocation65_spill] sm:$0xff] %v3037_v35  ;;  %v3039_v36 = vld [vmem:[#allocation8 + $0x58] sm:$0xff]  ;;  %v3041_v37 = vld [vmem:[#allocation8 + $0x60] sm:$0xff] }
  0x96   : > { %4123 = vst [vmem:[#allocation66_spill] sm:$0xff] %v3039_v36  ;;  %4124 = vst [vmem:[#allocation67_spill] sm:$0xff] %v3041_v37  ;;  %v3043_v38 = vld [vmem:[#allocation8 + $0x68] sm:$0xff]  ;;  %v3045_v39 = vld [vmem:[#allocation8 + $0x70] sm:$0xff] }
  0x97   : > { %4125 = vst [vmem:[#allocation68_spill] sm:$0xff] %v3045_v39  ;;  %v3047_v40 = vld [vmem:[#allocation8 + $0x78] sm:$0xff]  ;;  %v3049_v41 = vld [vmem:[#allocation8 + $0x80] sm:$0xff]  ;;  %v3051_v42 = vld [vmem:[#allocation8 + $0x88] sm:$0xff] }
  0x98   : > { %4126 = vst [vmem:[#allocation69_spill] sm:$0xff] %v3047_v40  ;;  %4127 = vst [vmem:[#allocation70_spill] sm:$0xff] %v3049_v41  ;;  %v3053_v43 = vld [vmem:[#allocation8 + $0x90] sm:$0xff]  ;;  %v3055_v44 = vld [vmem:[#allocation8 + $0x98] sm:$0xff] }
  0x99   : > { %4128 = vst [vmem:[#allocation71_spill] sm:$0xff] %v3051_v42  ;;  %v3057_v45 = vld [vmem:[#allocation8 + $0xa0] sm:$0xff]  ;;  %v3059_v46 = vld [vmem:[#allocation8 + $0xa8] sm:$0xff]  ;;  %v3061_v47 = vld [vmem:[#allocation8 + $0xb0] sm:$0xff] }
  0x9a   : > { %4129 = vst [vmem:[#allocation72_spill] sm:$0xff] %v3061_v47  ;;  %v3063_v48 = vld [vmem:[#allocation8 + $0xb8] sm:$0xff]  ;;  %v3065_v49 = vld [vmem:[#allocation8 + $0xc0] sm:$0xff]  ;;  %v3067_v50 = vld [vmem:[#allocation8 + $0xc8] sm:$0xff] }
  0x9b   : > { %4130 = vst [vmem:[#allocation73_spill] sm:$0xff] %v3063_v48  ;;  %v3069_v51 = vld [vmem:[#allocation8 + $0xd0] sm:$0xff]  ;;  %v3071_v52 = vld [vmem:[#allocation8 + $0xd8] sm:$0xff]  ;;  %v3073_v53 = vld [vmem:[#allocation8 + $0xe0] sm:$0xff] }
  0x9c   : > { %4131 = vst [vmem:[#allocation74_spill] sm:$0xff] %v3073_v53  ;;  %v3075_v54 = vld [vmem:[#allocation8 + $0xe8] sm:$0xff]  ;;  %v3077_v55 = vld [vmem:[#allocation8 + $0xf0] sm:$0xff]  ;;  %v3079_v56 = vld [vmem:[#allocation8 + $0xf8] sm:$0xff] }
  0x9d   : > { %4132 = vst [vmem:[#allocation75_spill] sm:$0xff] %v3075_v54  ;;  %v3081_v57 = vld [vmem:[#allocation8 + $0x100] sm:$0xff]  ;;  %v3083_v58 = vld [vmem:[#allocation8 + $0x108] sm:$0xff]  ;;  %v3085_v59 = vld [vmem:[#allocation8 + $0x110] sm:$0xff] }
  0x9e   : > { %4133 = vst [vmem:[#allocation76_spill] sm:$0xff] %v3085_v59  ;;  %v3087_v60 = vld [vmem:[#allocation8 + $0x118] sm:$0xff]  ;;  %v3089_v61 = vld [vmem:[#allocation8 + $0x120] sm:$0xff]  ;;  %v3091_v62 = vld [vmem:[#allocation8 + $0x128] sm:$0xff] }
  0x9f   : > { %4134 = vst [vmem:[#allocation77_spill] sm:$0xff] %v3087_v60  ;;  %v3093_v63 = vld [vmem:[#allocation8 + $0x130] sm:$0xff]  ;;  %v3095_v0 = vld [vmem:[#allocation8 + $0x138] sm:$0xff]  ;;  %v3097_v22 = vld [vmem:[#allocation8 + $0x140] sm:$0xff] }
  0xa0   : > { %4135 = vst [vmem:[#allocation78_spill] sm:$0xff] %v3097_v22  ;;  %v3099_v23 = vld [vmem:[#allocation8 + $0x148] sm:$0xff]  ;;  %v3101_v19 = vld [vmem:[#allocation8 + $0x150] sm:$0xff]  ;;  %v3103_v20 = vld [vmem:[#allocation8 + $0x158] sm:$0xff] }
  0xa1   : > { %4136 = vst [vmem:[#allocation79_spill] sm:$0xff] %v3099_v23  ;;  %v3105_v16 = vld [vmem:[#allocation8 + $0x160] sm:$0xff]  ;;  %v3107_v17 = vld [vmem:[#allocation8 + $0x168] sm:$0xff]  ;;  %v3109_v13 = vld [vmem:[#allocation8 + $0x170] sm:$0xff] }
  0xa2   : > { %4137 = vst [vmem:[#allocation80_spill] sm:$0xff] %v3109_v13  ;;  %v3111_v14 = vld [vmem:[#allocation8 + $0x178] sm:$0xff]  ;;  %v3113_v10 = vld [vmem:[#allocation8 + $0x180] sm:$0xff]  ;;  %v3115_v24 = vld [vmem:[#allocation8 + $0x188] sm:$0xff] }
  0xa3   : > { %4138 = vst [vmem:[#allocation81_spill] sm:$0xff] %v3111_v14  ;;  %v3117_v11 = vld [vmem:[#allocation8 + $0x190] sm:$0xff]  ;;  %v3119_v7 = vld [vmem:[#allocation8 + $0x198] sm:$0xff]  ;;  %v3121_v21 = vld [vmem:[#allocation8 + $0x1a0] sm:$0xff] }
  0xa4   : > { %4139 = vst [vmem:[#allocation82_spill] sm:$0xff] %v3121_v21  ;;  %v3123_v18 = vld [vmem:[#allocation8 + $0x1a8] sm:$0xff]  ;;  %v3125_v8 = vld [vmem:[#allocation8 + $0x1b0] sm:$0xff]  ;;  %v3127_v4 = vld [vmem:[#allocation8 + $0x1b8] sm:$0xff] }
  0xa5   : > { %4140 = vst [vmem:[#allocation83_spill] sm:$0xff] %v3123_v18  ;;  %v3129_v15 = vld [vmem:[#allocation8 + $0x1c0] sm:$0xff]  ;;  %v3131_v12 = vld [vmem:[#allocation8 + $0x1c8] sm:$0xff]  ;;  %v3133_v5 = vld [vmem:[#allocation8 + $0x1d0] sm:$0xff] }
  0xa6   : > { %4141 = vst [vmem:[#allocation84_spill] sm:$0xff] %v3133_v5  ;;  %v3135_v1 = vld [vmem:[#allocation8 + $0x1d8] sm:$0xff]  ;;  %v3137_v9 = vld [vmem:[#allocation8 + $0x1e0] sm:$0xff]  ;;  %v3139_v6 = vld [vmem:[#allocation8 + $0x1e8] sm:$0xff] }
  0xa7   : > { %4142 = vst [vmem:[#allocation85_spill] sm:$0xff] %v3135_v1  ;;  %v3141_v3 = vld [vmem:[#allocation8 + $0x1f0] sm:$0xff]  ;;  %v3143_v2 = vld [vmem:[#allocation8 + $0x1f8] sm:$0xff]  ;;  %v3145_v29 = vld [vmem:[#allocation8 + $0x200] sm:$0xff] }
  0xa8   : > { %4143 = vst [vmem:[#allocation86_spill] sm:$0xff] %v3145_v29  ;;  %v3147_v30 = vld [vmem:[#allocation8 + $0x208] sm:$0xff]  ;;  %v3149_v35 = vld [vmem:[#allocation8 + $0x210] sm:$0xff]  ;;  %v3151_v36 = vld [vmem:[#allocation8 + $0x218] sm:$0xff] }
  0xa9   : > { %4144 = vst [vmem:[#allocation87_spill] sm:$0xff] %v3147_v30  ;;  %v3153_v41 = vld [vmem:[#allocation8 + $0x220] sm:$0xff]  ;;  %v3155_v42 = vld [vmem:[#allocation8 + $0x228] sm:$0xff]  ;;  %v3157_v47 = vld [vmem:[#allocation8 + $0x230] sm:$0xff] }
  0xaa   : > { %4145 = vst [vmem:[#allocation88_spill] sm:$0xff] %v3157_v47  ;;  %v3159_v48 = vld [vmem:[#allocation8 + $0x238] sm:$0xff]  ;;  %v3161_v53 = vld [vmem:[#allocation8 + $0x240] sm:$0xff]  ;;  %v3163_v54 = vld [vmem:[#allocation8 + $0x248] sm:$0xff] }
  0xab   : > { %4146 = vst [vmem:[#allocation89_spill] sm:$0xff] %v3159_v48  ;;  %v3165_v59 = vld [vmem:[#allocation8 + $0x250] sm:$0xff]  ;;  %v3167_v60 = vld [vmem:[#allocation8 + $0x258] sm:$0xff]  ;;  %v3169_v22 = vld [vmem:[#allocation8 + $0x260] sm:$0xff] }
  0xac   : > { %4147 = vst [vmem:[#allocation90_spill] sm:$0xff] %v3169_v22  ;;  %v3171_v23 = vld [vmem:[#allocation8 + $0x268] sm:$0xff]  ;;  %v3173_v13 = vld [vmem:[#allocation8 + $0x270] sm:$0xff]  ;;  %v3175_v14 = vld [vmem:[#allocation8 + $0x278] sm:$0xff] }
  0xad   : > { %4148 = vst [vmem:[#allocation91_spill] sm:$0xff] %v3171_v23  ;;  %v3177_v21 = vld [vmem:[#allocation8 + $0x280] sm:$0xff]  ;;  %v3179_v18 = vld [vmem:[#allocation8 + $0x288] sm:$0xff]  ;;  %v3181_v5 = vld [vmem:[#allocation8 + $0x290] sm:$0xff] }
  0xae   : > { %4149 = vst [vmem:[#allocation92_spill] sm:$0xff] %v3181_v5  ;;  %v3183_v1 = vld [vmem:[#allocation8 + $0x298] sm:$0xff]  ;;  %v3185_v29 = vld [vmem:[#allocation8 + $0x2a0] sm:$0xff]  ;;  %v3187_v30 = vld [vmem:[#allocation8 + $0x2a8] sm:$0xff] }
  0xaf   : > { %4150 = vst [vmem:[#allocation93_spill] sm:$0xff] %v3183_v1  ;;  %v3189_v47 = vld [vmem:[#allocation8 + $0x2b0] sm:$0xff]  ;;  %v3191_v48 = vld [vmem:[#allocation8 + $0x2b8] sm:$0xff]  ;;  %v3193_v22 = vld [vmem:[#allocation8 + $0x2c0] sm:$0xff] }
  0xb0   : > { %4151 = vst [vmem:[#allocation94_spill] sm:$0xff] %v3193_v22  ;;  %v3195_v23 = vld [vmem:[#allocation8 + $0x2c8] sm:$0xff]  ;;  %v3197_v5 = vld [vmem:[#allocation8 + $0x2d0] sm:$0xff]  ;;  %v3199_v1 = vld [vmem:[#allocation8 + $0x2d8] sm:$0xff] }
  0xb1   : > { %4152 = vst [vmem:[#allocation95_spill] sm:$0xff] %v3195_v23  ;;  %v3201_v27 = vld [vmem:[#allocation8 + $0x2e0] sm:$0xff]  ;;  %v3203_v25 = vld [vmem:[#allocation8 + $0x2e8] sm:$0xff]  ;;  %v3205_v28 = vld [vmem:[#allocation8 + $0x2f0] sm:$0xff] }
  0xb2   : > { %4153 = vst [vmem:[#allocation96_spill] sm:$0xff] %v3205_v28  ;;  %v3207_v22 = vld [vmem:[#allocation8 + $0x2f8] sm:$0xff]  ;;  %v3210_v23 = vld [vmem:[%s2956_s0] sm:$0xff]  ;;  %v3213_v26 = vld [vmem:[%s2956_s0 + $0x8] sm:$0xff] }
  0xb3   : > { %4154 = vst [vmem:[#allocation97_spill] sm:$0xff] %v3207_v22  ;;  %4155 = vst [vmem:[#allocation98_spill] sm:$0xff] %v3210_v23  ;;  %v3216_v33 = vld [vmem:[%s2956_s0 + $0x10] sm:$0xff]  ;;  %v3219_v31 = vld [vmem:[%s2956_s0 + $0x18] sm:$0xff] }
  0xb4   : > { %4156 = vst [vmem:[#allocation99_spill] sm:$0xff] %v3213_v26  ;;  %4157 = vst [vmem:[#allocation100_spill] sm:$0xff] %v3216_v33  ;;  %v3222_v34 = vld [vmem:[%s2956_s0 + $0x20] sm:$0xff]  ;;  %v3225_v32 = vld [vmem:[%s2956_s0 + $0x28] sm:$0xff] }
  0xb5   : > { %4158 = vst [vmem:[#allocation101_spill] sm:$0xff] %v3219_v31  ;;  %4159 = vst [vmem:[#allocation102_spill] sm:$0xff] %v3222_v34  ;;  %v3228_v39 = vld [vmem:[%s2956_s0 + $0x30] sm:$0xff]  ;;  %v3231_v28 = vld [vmem:[%s2956_s0 + $0x38] sm:$0xff]  ;;  %458 = sbr.rel (%p2054_p2) target bundleno = 207 (0xcf), region = 60 }
  0xb6   : > { %v3234_v37 = vld [vmem:[%s2956_s0 + $0x40] sm:$0xff]  ;;  %v3237_v22 = vld [vmem:[%s2956_s0 + $0x48] sm:$0xff]  ;;  %v3240_v23 = vld [vmem:[%s2956_s0 + $0x50] sm:$0xff] }
  0xb7   : > { %4160 = vst [vmem:[#allocation103_spill] sm:$0xff] %v3234_v37  ;;  %v3243_v40 = vld [vmem:[%s2956_s0 + $0x58] sm:$0xff]  ;;  %v3246_v26 = vld [vmem:[%s2956_s0 + $0x60] sm:$0xff]  ;;  %v3249_v33 = vld [vmem:[%s2956_s0 + $0x68] sm:$0xff] }
  0xb8   : > { %v3252_v31 = vld [vmem:[%s2956_s0 + $0x70] sm:$0xff]  ;;  %v3255_v34 = vld [vmem:[%s2956_s0 + $0x78] sm:$0xff] }
  0xb9   : > { %4161 = vst [vmem:[#allocation104_spill] sm:$0xff] %v3255_v34 }
  0xba   : > { %vm459_vm0 = vcmask 7168   ;;  %v2692_v37 = vmov -1e+30   ;;  %v2693_v34 = vmov 0.0  }
  0xbb   : > { %460 = vst.msk [vmem:[#allocation2] sm:$0xff] %vm459_vm0, %v2692_v37  ;;  %461 = vst.msk [vmem:[#allocation2 + $0x8] sm:$0xff] %vm459_vm0, %v2692_v37 }
  0xbc   : > { %462 = vst.msk [vmem:[#allocation2 + $0x10] sm:$0xff] %vm459_vm0, %v2692_v37  ;;  %463 = vst.msk [vmem:[#allocation2 + $0x18] sm:$0xff] %vm459_vm0, %v2692_v37 }
  0xbd   : > { %464 = vst.msk [vmem:[#allocation2 + $0x20] sm:$0xff] %vm459_vm0, %v2692_v37  ;;  %465 = vst.msk [vmem:[#allocation2 + $0x28] sm:$0xff] %vm459_vm0, %v2692_v37 }
  0xbe   : > { %466 = vst.msk [vmem:[#allocation2 + $0x30] sm:$0xff] %vm459_vm0, %v2692_v37  ;;  %467 = vst.msk [vmem:[#allocation2 + $0x38] sm:$0xff] %vm459_vm0, %v2692_v37 }
  0xbf   : > { %468 = vst.msk [vmem:[#allocation3] sm:$0xff] %vm459_vm0, %v2693_v34  ;;  %469 = vst.msk [vmem:[#allocation3 + $0x8] sm:$0xff] %vm459_vm0, %v2693_v34 }
  0xc0   : > { %470 = vst.msk [vmem:[#allocation3 + $0x10] sm:$0xff] %vm459_vm0, %v2693_v34  ;;  %471 = vst.msk [vmem:[#allocation3 + $0x18] sm:$0xff] %vm459_vm0, %v2693_v34 }
  0xc1   : > { %472 = vst.msk [vmem:[#allocation3 + $0x20] sm:$0xff] %vm459_vm0, %v2693_v34  ;;  %473 = vst.msk [vmem:[#allocation3 + $0x28] sm:$0xff] %vm459_vm0, %v2693_v34 }
  0xc2   : > { %474 = vst.msk [vmem:[#allocation3 + $0x30] sm:$0xff] %vm459_vm0, %v2693_v34  ;;  %475 = vst.msk [vmem:[#allocation3 + $0x38] sm:$0xff] %vm459_vm0, %v2693_v34 }
  0xc3   : > { %476 = vst [vmem:[#allocation4 + $0xb0] sm:$0xff] %v2693_v34  ;;  %477 = vst [vmem:[#allocation4] sm:$0xff] %v2693_v34 }
  0xc4   : > { %478 = vst [vmem:[#allocation4 + $0x10] sm:$0xff] %v2693_v34  ;;  %479 = vst [vmem:[#allocation4 + $0x48] sm:$0xff] %v2693_v34 }
  0xc5   : > { %480 = vst [vmem:[#allocation4 + $0x60] sm:$0xff] %v2693_v34  ;;  %481 = vst [vmem:[#allocation4 + $0x28] sm:$0xff] %v2693_v34 }
  0xc6   : > { %482 = vst [vmem:[#allocation4 + $0x40] sm:$0xff] %v2693_v34  ;;  %483 = vst [vmem:[#allocation4 + $0x78] sm:$0xff] %v2693_v34 }
  0xc7   : > { %484 = vst [vmem:[#allocation4 + $0x88] sm:$0xff] %v2693_v34  ;;  %485 = vst [vmem:[#allocation4 + $0x90] sm:$0xff] %v2693_v34 }
  0xc8   : > { %486 = vst [vmem:[#allocation4 + $0x18] sm:$0xff] %v2693_v34  ;;  %487 = vst [vmem:[#allocation4 + $0x98] sm:$0xff] %v2693_v34 }
  0xc9   : > { %488 = vst [vmem:[#allocation4 + $0x38] sm:$0xff] %v2693_v34  ;;  %489 = vst [vmem:[#allocation4 + $0x50] sm:$0xff] %v2693_v34 }
  0xca   : > { %490 = vst [vmem:[#allocation4 + $0x70] sm:$0xff] %v2693_v34  ;;  %491 = vst [vmem:[#allocation4 + $0xa0] sm:$0xff] %v2693_v34 }
  0xcb   : > { %492 = vst [vmem:[#allocation4 + $0xa8] sm:$0xff] %v2693_v34  ;;  %493 = vst [vmem:[#allocation4 + $0x68] sm:$0xff] %v2693_v34 }
  0xcc   : > { %494 = vst [vmem:[#allocation4 + $0x30] sm:$0xff] %v2693_v34  ;;  %495 = vst [vmem:[#allocation4 + $0x58] sm:$0xff] %v2693_v34 }
  0xcd   : > { %496 = vst [vmem:[#allocation4 + $0x80] sm:$0xff] %v2693_v34  ;;  %497 = vst [vmem:[#allocation4 + $0xb8] sm:$0xff] %v2693_v34 }
  0xce   : > { %498 = vst [vmem:[#allocation4 + $0x20] sm:$0xff] %v2693_v34  ;;  %499 = vst [vmem:[#allocation4 + $0x8] sm:$0xff] %v2693_v34 }
  0xcf PF: > { %500 = vmatprep.subr.mxu0 %v3199_v1  ;;  %661 = vmatprep.subr.mxu1 %v3203_v25  ;;  %v4164_v1 = vld [vmem:[#allocation67_spill] sm:$0xff]  ;;  %v4185_v25 = vld [vmem:[#allocation90_spill] sm:$0xff]  ;;  %v4192_v37 = vld [vmem:[#allocation84_spill] sm:$0xff]  ;;  %vm1359_vm1 = vcmask 7168   ;;  %s4245_s28 = sld [smem:[#allocation21_spill]] }
  0xd0   : > { %501 = vmatpush1.msra.mxu0 %v3197_v5  ;;  %662 = vmatpush1.msra.mxu1 %v3201_v27  ;;  %v4168_v5 = vld [vmem:[#allocation61_spill] sm:$0xff]  ;;  %v4189_v34 = vld [vmem:[#allocation87_spill] sm:$0xff] }
  0xd1   : > { %502 = vmatprep.subr.mxu0 %v3187_v30  ;;  %663 = vmatprep.subr.mxu1 %v3191_v48  ;;  %v4186_v27 = vld [vmem:[#allocation102_spill] sm:$0xff]  ;;  %v4188_v30 = vld [vmem:[#allocation88_spill] sm:$0xff] }
  0xd2   : > { %503 = vmatpush1.msra.mxu0 %v3185_v29  ;;  %664 = vmatpush1.msra.mxu1 %v3189_v47  ;;  %v4187_v29 = vld [vmem:[#allocation89_spill] sm:$0xff]  ;;  %v4201_v48 = vld [vmem:[#allocation76_spill] sm:$0xff] }
  0xd3   : > { %504 = vmatprep.subr.mxu0 %v3175_v14  ;;  %665 = vmatprep.subr.mxu1 %v3179_v18  ;;  %v4176_v14 = vld [vmem:[#allocation96_spill] sm:$0xff]  ;;  %v4200_v47 = vld [vmem:[#allocation77_spill] sm:$0xff] }
  0xd4   : > { %505 = vmatpush1.msra.mxu0 %v3173_v13  ;;  %666 = vmatpush1.msra.mxu1 %v3177_v21  ;;  %v4175_v13 = vld [vmem:[#allocation97_spill] sm:$0xff]  ;;  %v4180_v18 = vld [vmem:[#allocation100_spill] sm:$0xff] }
  0xd5   : > { %506 = vmatprep.subr.mxu0 %v3163_v54  ;;  %667 = vmatprep.subr.mxu1 %v3167_v60  ;;  %v4183_v21 = vld [vmem:[#allocation101_spill] sm:$0xff]  ;;  %v4207_v54 = vld [vmem:[#allocation70_spill] sm:$0xff]  ;;  %v4213_v60 = vld [vmem:[#allocation32_spill] sm:$0xff]  ;;  %p2056_p12 = scmp.ne.s32.totalorder %s4245_s28, 2 }
  0xd6   : > { %507 = vmatpush1.msra.mxu0 %v3161_v53  ;;  %668 = vmatpush1.msra.mxu1 %v3165_v59  ;;  %v4206_v53 = vld [vmem:[#allocation71_spill] sm:$0xff]  ;;  %s4246_s30 = sld [smem:[#allocation106_spill]] (!%p2056_p12) }
  0xd7   : > { %508 = vmatprep.subr.mxu0 %v3151_v36  ;;  %669 = vmatprep.subr.mxu1 %v3155_v42  ;;  %v4191_v36 = vld [vmem:[#allocation85_spill] sm:$0xff]  ;;  %v4195_v42 = vld [vmem:[#allocation103_spill] sm:$0xff] }
  0xd8   : > { %509 = vmatpush1.msra.mxu0 %v3149_v35  ;;  %670 = vmatpush1.msra.mxu1 %v3153_v41  ;;  %v4190_v35 = vld [vmem:[#allocation86_spill] sm:$0xff]  ;;  %v4212_v59 = vld [vmem:[#allocation59_spill] sm:$0xff] }
  0xd9   : > { %510 = vmatprep.subr.mxu0 %v3139_v6  ;;  %671 = vmatprep.subr.mxu1 %v3143_v2  ;;  %v4165_v2 = vld [vmem:[#allocation68_spill] sm:$0xff]  ;;  %v4169_v6 = vld [vmem:[#allocation63_spill] sm:$0xff]  ;;  %v4194_v41 = vld [vmem:[#allocation82_spill] sm:$0xff] }
  0xda   : > { %511 = vmatpush1.msra.mxu0 %v3137_v9  ;;  %672 = vmatpush1.msra.mxu1 %v3141_v3  ;;  %v4166_v3 = vld [vmem:[#allocation62_spill] sm:$0xff]  ;;  %v4172_v9 = vld [vmem:[#allocation55_spill] sm:$0xff] }
  0xdb   : > { %512 = vmatprep.subr.mxu0 %v3127_v4  ;;  %673 = vmatprep.subr.mxu1 %v3131_v12  ;;  %v4167_v4 = vld [vmem:[#allocation64_spill] sm:$0xff]  ;;  %v4174_v12 = vld [vmem:[#allocation98_spill] sm:$0xff] }
  0xdc   : > { %513 = vmatpush1.msra.mxu0 %v3125_v8  ;;  %674 = vmatpush1.msra.mxu1 %v3129_v15  ;;  %v4171_v8 = vld [vmem:[#allocation58_spill] sm:$0xff]  ;;  %v4177_v15 = vld [vmem:[#allocation99_spill] sm:$0xff] }
  0xdd   : > { %514 = vmatprep.subr.mxu0 %v3115_v24  ;;  %675 = vmatprep.subr.mxu1 %v3119_v7  ;;  %v4170_v7 = vld [vmem:[#allocation56_spill] sm:$0xff]  ;;  %v4184_v24 = vld [vmem:[#allocation91_spill] sm:$0xff] }
  0xde   : > { %515 = vmatpush1.msra.mxu0 %v3113_v10  ;;  %676 = vmatpush1.msra.mxu1 %v3117_v11  ;;  %v4049_v10 = vmov 0.0   ;;  %v4173_v11 = vld [vmem:[#allocation57_spill] sm:$0xff] }
  0xdf   : > { %516 = vmatprep.subr.mxu0 %v3103_v20  ;;  %677 = vmatprep.subr.mxu1 %v3107_v17  ;;  %v4179_v17 = vld [vmem:[#allocation94_spill] sm:$0xff]  ;;  %v4182_v20 = vld [vmem:[#allocation92_spill] sm:$0xff] }
  0xe0   : > { %517 = vmatpush1.msra.mxu0 %v3101_v19  ;;  %678 = vmatpush1.msra.mxu1 %v3105_v16  ;;  %v4178_v16 = vld [vmem:[#allocation95_spill] sm:$0xff]  ;;  %v4181_v19 = vld [vmem:[#allocation93_spill] sm:$0xff] }
  0xe1   : > { %518 = vmatprep.subr.mxu0 %v3091_v62  ;;  %679 = vmatprep.subr.mxu1 %v3095_v0  ;;  %v4163_v0 = vld [vmem:[#allocation69_spill] sm:$0xff] }
  0xe2   : > { %519 = vmatpush1.msra.mxu0 %v3089_v61  ;;  %680 = vmatpush1.msra.mxu1 %v3093_v63 }
  0xe3   : > { %520 = vmatprep.subr.mxu0 %v3079_v56  ;;  %681 = vmatprep.subr.mxu1 %v3083_v58  ;;  %v4209_v56 = vld [vmem:[#allocation65_spill] sm:$0xff]  ;;  %v4211_v58 = vld [vmem:[#allocation60_spill] sm:$0xff] }
  0xe4   : > { %521 = vmatpush1.msra.mxu0 %v3077_v55  ;;  %682 = vmatpush1.msra.mxu1 %v3081_v57  ;;  %v4208_v55 = vld [vmem:[#allocation66_spill] sm:$0xff]  ;;  %v4210_v57 = vld [vmem:[#allocation104_spill] sm:$0xff] }
  0xe5   : > { %522 = vmatprep.subr.mxu0 %v3067_v50  ;;  %683 = vmatprep.subr.mxu1 %v3071_v52  ;;  %v4203_v50 = vld [vmem:[#allocation74_spill] sm:$0xff]  ;;  %v4205_v52 = vld [vmem:[#allocation72_spill] sm:$0xff] }
  0xe6   : > { %523 = vmatpush1.msra.mxu0 %v3065_v49  ;;  %684 = vmatpush1.msra.mxu1 %v3069_v51  ;;  %v4202_v49 = vld [vmem:[#allocation75_spill] sm:$0xff]  ;;  %v4204_v51 = vld [vmem:[#allocation73_spill] sm:$0xff] }
  0xe7   : > { %524 = vmatprep.subr.mxu0 %v3055_v44  ;;  %685 = vmatprep.subr.mxu1 %v3059_v46  ;;  %v4197_v44 = vld [vmem:[#allocation80_spill] sm:$0xff]  ;;  %v4199_v46 = vld [vmem:[#allocation78_spill] sm:$0xff] }
  0xe8   : > { %525 = vmatpush1.msra.mxu0 %v3053_v43  ;;  %686 = vmatpush1.msra.mxu1 %v3057_v45  ;;  %v4196_v43 = vld [vmem:[#allocation81_spill] sm:$0xff]  ;;  %v4198_v45 = vld [vmem:[#allocation79_spill] sm:$0xff] }
  0xe9   : > { %526 = vmatprep.subr.mxu0 %v3043_v38  ;;  %687 = vmatprep.subr.mxu1 %v4163_v0  ;;  %v4193_v38 = vld [vmem:[#allocation83_spill] sm:$0xff] }
  0xea   : > { %527 = vmatpush1.msra.mxu0 %v4164_v1  ;;  %688 = vmatpush1.msra.mxu1 %v4165_v2 }
  0xeb   : > { %528 = vmatprep.subr.mxu0 %v4166_v3  ;;  %689 = vmatprep.subr.mxu1 %v4167_v4 }
  0xec   : > { %529 = vmatpush1.msra.mxu0 %v4168_v5  ;;  %690 = vmatpush1.msra.mxu1 %v4169_v6 }
  0xed   : > { %530 = vmatprep.subr.mxu0 %v4170_v7  ;;  %691 = vmatprep.subr.mxu1 %v4171_v8 }
  0xee   : > { %531 = vmatpush1.msra.mxu0 %v4172_v9  ;;  %564 = vmatprep.mubr.f32.mxu0 %v4049_v10 }
  0xef   : > { %692 = vmatpush1.msra.mxu1 %v4173_v11  ;;  %725 = vmatprep.mubr.f32.mxu1 %v4049_v10 }
  0xf0   : > { %565 = vmatmul.mubr.f32.vlgmr.msra.gmra.mxu0 %v4174_v12  ;;  %726 = vmatmul.mubr.f32.vlgmr.msra.gmra.mxu1 %v4174_v12 }
  0xf1   : > { %570 = vmatprep.mubr.f32.mxu0 %v4049_v10  ;;  %731 = vmatprep.mubr.f32.mxu1 %v4049_v10 }
  0xf2   : > { %822 = vmatprep.subr.mxu0 %v4175_v13 }
  0xf3   : > { %823 = vmatpush1.msra.mxu0 %v4176_v14 }
  0xf4   : > { %571 = vmatmul.mubr.f32.gmra.mxu0 %v4177_v15  ;;  %732 = vmatmul.mubr.f32.gmra.mxu1 %v4177_v15 }
  0xf5   : > { %576 = vmatprep.mubr.f32.mxu0 %v4049_v10  ;;  %737 = vmatprep.mubr.f32.mxu1 %v4049_v10 }
  0xf6   : > { %824 = vmatprep.subr.mxu0 %v4178_v16 }
  0xf7   : > { %825 = vmatpush1.msra.mxu0 %v4179_v17 }
  0xf8   : > { %577 = vmatmul.mubr.f32.gmra.mxu0 %v4180_v18  ;;  %738 = vmatmul.mubr.f32.gmra.mxu1 %v4180_v18 }
  0xf9   : > { %582 = vmatprep.mubr.f32.mxu0 %v4049_v10  ;;  %743 = vmatprep.mubr.f32.mxu1 %v4049_v10 }
  0xfa   : > { %826 = vmatprep.subr.mxu0 %v4181_v19 }
  0xfb   : > { %827 = vmatpush1.msra.mxu0 %v4182_v20 }
  0xfc   : > { %583 = vmatmul.mubr.f32.gmra.mxu0 %v4183_v21  ;;  %744 = vmatmul.mubr.f32.gmra.mxu1 %v4183_v21 }
  0xfd   : > { %588 = vmatprep.mubr.f32.mxu0 %v4049_v10  ;;  %749 = vmatprep.mubr.f32.mxu1 %v4049_v10 }
  0xfe   : > { %828 = vmatprep.subr.mxu0 %v4184_v24 }
  0xff   : > { %829 = vmatpush1.msra.mxu0 %v4185_v25 }
 0x100   : > { %589 = vmatmul.mubr.f32.gmra.mxu0 %v4186_v27  ;;  %750 = vmatmul.mubr.f32.gmra.mxu1 %v4186_v27 }
 0x101   : > { %594 = vmatprep.mubr.f32.mxu0 %v4049_v10  ;;  %755 = vmatprep.mubr.f32.mxu1 %v4049_v10 }
 0x102   : > { %830 = vmatprep.subr.mxu0 %v4187_v29 }
 0x103   : > { %831 = vmatpush1.msra.mxu0 %v4188_v30 }
 0x104   : > { %595 = vmatmul.mubr.f32.gmra.mxu0 %v3225_v32  ;;  %756 = vmatmul.mubr.f32.gmra.mxu1 %v3225_v32 }
 0x105   : > { %600 = vmatprep.mubr.f32.mxu0 %v4049_v10  ;;  %761 = vmatprep.mubr.f32.mxu1 %v4049_v10 }
 0x106   : > { %832 = vmatprep.subr.mxu0 %v4189_v34 }
 0x107   : > { %833 = vmatpush1.msra.mxu0 %v4190_v35 }
 0x108   : > { %601 = vmatmul.mubr.f32.gmra.mxu0 %v3228_v39  ;;  %762 = vmatmul.mubr.f32.gmra.mxu1 %v3228_v39 }
 0x109   : > { %606 = vmatprep.mubr.f32.mxu0 %v4049_v10  ;;  %767 = vmatprep.mubr.f32.mxu1 %v4049_v10 }
 0x10a   : > { %834 = vmatprep.subr.mxu0 %v4191_v36 }
 0x10b   : > { %835 = vmatpush1.msra.mxu0 %v4192_v37 }
 0x10c   : > { %607 = vmatmul.mubr.f32.gmra.mxu0 %v3231_v28  ;;  %768 = vmatmul.mubr.f32.gmra.mxu1 %v3231_v28 }
 0x10d   : > { %612 = vmatprep.mubr.f32.mxu0 %v4049_v10  ;;  %773 = vmatprep.mubr.f32.mxu1 %v4049_v10 }
 0x10e   : > { %836 = vmatprep.subr.mxu0 %v4193_v38 }
 0x10f   : > { %837 = vmatpush1.msra.mxu0 %v4194_v41 }
 0x110   : > { %613 = vmatmul.mubr.f32.gmra.mxu0 %v4195_v42  ;;  %774 = vmatmul.mubr.f32.gmra.mxu1 %v4195_v42 }
 0x111   : > { %618 = vmatprep.mubr.f32.mxu0 %v4049_v10  ;;  %779 = vmatprep.mubr.f32.mxu1 %v4049_v10 }
 0x112   : > { %838 = vmatprep.subr.mxu0 %v4196_v43 }
 0x113   : > { %839 = vmatpush1.msra.mxu0 %v4197_v44 }
 0x114   : > { %619 = vmatmul.mubr.f32.gmra.mxu0 %v3237_v22  ;;  %780 = vmatmul.mubr.f32.gmra.mxu1 %v3237_v22 }
 0x115   : > { %624 = vmatprep.mubr.f32.mxu0 %v4049_v10  ;;  %785 = vmatprep.mubr.f32.mxu1 %v4049_v10 }
 0x116   : > { %840 = vmatprep.subr.mxu0 %v4198_v45 }
 0x117   : > { %841 = vmatpush1.msra.mxu0 %v4199_v46 }
 0x118   : > { %625 = vmatmul.mubr.f32.gmra.mxu0 %v3240_v23  ;;  %786 = vmatmul.mubr.f32.gmra.mxu1 %v3240_v23 }
 0x119   : > { %630 = vmatprep.mubr.f32.mxu0 %v4049_v10  ;;  %791 = vmatprep.mubr.f32.mxu1 %v4049_v10 }
 0x11a   : > { %842 = vmatprep.subr.mxu0 %v4200_v47 }
 0x11b   : > { %843 = vmatpush1.msra.mxu0 %v4201_v48 }
 0x11c   : > { %631 = vmatmul.mubr.f32.gmra.mxu0 %v3243_v40  ;;  %792 = vmatmul.mubr.f32.gmra.mxu1 %v3243_v40 }
 0x11d   : > { %636 = vmatprep.mubr.f32.mxu0 %v4049_v10  ;;  %797 = vmatprep.mubr.f32.mxu1 %v4049_v10 }
 0x11e   : > { %844 = vmatprep.subr.mxu0 %v4202_v49 }
 0x11f   : > { %845 = vmatpush1.msra.mxu0 %v4203_v50 }
 0x120   : > { %637 = vmatmul.mubr.f32.gmra.mxu0 %v3246_v26  ;;  %798 = vmatmul.mubr.f32.gmra.mxu1 %v3246_v26 }
 0x121   : > { %642 = vmatprep.mubr.f32.mxu0 %v4049_v10  ;;  %803 = vmatprep.mubr.f32.mxu1 %v4049_v10 }
 0x122   : > { %846 = vmatprep.subr.mxu0 %v4204_v51 }
 0x123   : > { %847 = vmatpush1.msra.mxu0 %v4205_v52 }
 0x124   : > { %643 = vmatmul.mubr.f32.gmra.mxu0 %v3249_v33  ;;  %804 = vmatmul.mubr.f32.gmra.mxu1 %v3249_v33 }
 0x125   : > { %648 = vmatprep.mubr.f32.mxu0 %v4049_v10  ;;  %809 = vmatprep.mubr.f32.mxu1 %v4049_v10 }
 0x126   : > { %848 = vmatprep.subr.mxu0 %v4206_v53 }
 0x127   : > { %849 = vmatpush1.msra.mxu0 %v4207_v54 }
 0x128   : > { %649 = vmatmul.mubr.f32.gmra.mxu0 %v3252_v31  ;;  %810 = vmatmul.mubr.f32.gmra.mxu1 %v3252_v31 }
 0x129   : > { %654 = vmatprep.mubr.f32.mxu0 %v4049_v10  ;;  %815 = vmatprep.mubr.f32.mxu1 %v4049_v10 }
 0x12a   : > { %850 = vmatprep.subr.mxu0 %v4208_v55 }
 0x12b   : > { %851 = vmatpush1.msra.mxu0 %v4209_v56 }
 0x12c   : > { %655 = vmatmul.mubr.f32.gmra.mxu0 %v4210_v57  ;;  %816 = vmatmul.mubr.f32.gmra.mxu1 %v4210_v57 }
 0x12d   : > { %852 = vmatprep.subr.mxu0 %v4211_v58  ;;  %886 = vmatprep.mubr.f32.mxu0 %v4049_v10 }
 0x12e   : > { %853 = vmatpush1.msra.mxu0 %v4212_v59  ;;  %1053 = vmatprep.mubr.f32.mxu1 %v4213_v60 }
 0x130   : > { %887 = vmatmul.mubr.f32.vlgmr.msra.gmra.mxu0 %v4174_v12 }
 0x131   : > { %892 = vmatprep.mubr.f32.mxu0 %v4049_v10 }
 0x134   : > { %893 = vmatmul.mubr.f32.gmra.mxu0 %v4177_v15 }
 0x135   : > { %898 = vmatprep.mubr.f32.mxu0 %v4049_v10 }
 0x138   : > { %899 = vmatmul.mubr.f32.gmra.mxu0 %v4180_v18 }
 0x139   : > { %904 = vmatprep.mubr.f32.mxu0 %v4049_v10 }
 0x13c   : > { %905 = vmatmul.mubr.f32.gmra.mxu0 %v4183_v21 }
 0x13d   : > { %910 = vmatprep.mubr.f32.mxu0 %v4049_v10 }
 0x140   : > { %911 = vmatmul.mubr.f32.gmra.mxu0 %v4186_v27 }
 0x141   : > { %916 = vmatprep.mubr.f32.mxu0 %v4049_v10 }
 0x144   : > { %917 = vmatmul.mubr.f32.gmra.mxu0 %v3225_v32 }
 0x145   : > { %922 = vmatprep.mubr.f32.mxu0 %v4049_v10 }
 0x148   : > { %923 = vmatmul.mubr.f32.gmra.mxu0 %v3228_v39 }
 0x149   : > { %928 = vmatprep.mubr.f32.mxu0 %v4049_v10 }
 0x14c   : > { %929 = vmatmul.mubr.f32.gmra.mxu0 %v3231_v28 }
 0x14d   : > { %934 = vmatprep.mubr.f32.mxu0 %v4049_v10 }
 0x150   : > { %935 = vmatmul.mubr.f32.gmra.mxu0 %v4195_v42 }
 0x151   : > { %940 = vmatprep.mubr.f32.mxu0 %v4049_v10 }
 0x154   : > { %941 = vmatmul.mubr.f32.gmra.mxu0 %v3237_v22  ;;  %v4214_v22 = vld [vmem:[#allocation33_spill] sm:$0xff] }
 0x155   : > { %946 = vmatprep.mubr.f32.mxu0 %v4049_v10 }
 0x158   : > { %947 = vmatmul.mubr.f32.gmra.mxu0 %v3240_v23 }
 0x159   : > { %952 = vmatprep.mubr.f32.mxu0 %v4049_v10 }
 0x15c   : > { %953 = vmatmul.mubr.f32.gmra.mxu0 %v3243_v40 }
 0x15d   : > { %958 = vmatprep.mubr.f32.mxu0 %v4049_v10 }
 0x160   : > { %959 = vmatmul.mubr.f32.gmra.mxu0 %v3246_v26 }
 0x161   : > { %964 = vmatprep.mubr.f32.mxu0 %v4049_v10 }
 0x164   : > { %965 = vmatmul.mubr.f32.gmra.mxu0 %v3249_v33 }
 0x165   : > { %970 = vmatprep.mubr.f32.mxu0 %v4049_v10 }
 0x168   : > { %971 = vmatmul.mubr.f32.gmra.mxu0 %v3252_v31 }
 0x169   : > { %976 = vmatprep.mubr.f32.mxu0 %v4049_v10 }
 0x16c   : > { %977 = vmatmul.mubr.f32.gmra.mxu0 %v4210_v57 }
 0x16d   : > { %2140 = vmatprep.mubr.f32.mxu0 %v4214_v22 }
 0x1b0   : > { %v3471_v23 = vpop.f32.mrf.mxu0  ;;  %v3473_v28 = vpop.f32.mrf.mxu1 }
 0x1b2   : > { %v3475_v32 = vpop.f32.mrf.mxu0  ;;  %v3477_v26 = vpop.f32.mrf.mxu1 }
 0x1b3   : > { %4215 = vst [vmem:[#allocation69_spill] sm:$0xff] %v3477_v26 }
 0x1b4   : > { %v3479_v39 = vpop.f32.mrf.mxu0  ;;  %v3481_v33 = vpop.f32.mrf.mxu1 }
 0x1b6   : > { %v3483_v40 = vpop.f32.mrf.mxu0  ;;  %v3485_v31 = vpop.f32.mrf.mxu1 }
 0x1b7   : > { %4216 = vst [vmem:[#allocation67_spill] sm:$0xff] %v3485_v31 }
 0x1b8   : > { %v3487_v61 = vpop.f32.mrf.mxu0  ;;  %v3489_v62 = vpop.f32.mrf.mxu1 }
 0x1ba   : > { %v3491_v63 = vpop.f32.mrf.mxu0  ;;  %v3493_v0 = vpop.f32.mrf.mxu1 }
 0x1bb   : > { %4217 = vst [vmem:[#allocation68_spill] sm:$0xff] %v3493_v0 }
 0x1bc   : > { %v3495_v1 = vpop.f32.mrf.mxu0  ;;  %v3497_v2 = vpop.f32.mrf.mxu1 }
 0x1be   : > { %v3499_v3 = vpop.f32.mrf.mxu0  ;;  %v3501_v4 = vpop.f32.mrf.mxu1 }
 0x1c0   : > { %v3503_v5 = vpop.f32.mrf.mxu0  ;;  %v3505_v6 = vpop.f32.mrf.mxu1 }
 0x1c2   : > { %v3507_v7 = vpop.f32.mrf.mxu0  ;;  %v3509_v8 = vpop.f32.mrf.mxu1 }
 0x1c4   : > { %v3511_v9 = vpop.f32.mrf.mxu0  ;;  %v3513_v11 = vpop.f32.mrf.mxu1 }
 0x1c6   : > { %v3515_v12 = vpop.f32.mrf.mxu0  ;;  %v3517_v13 = vpop.f32.mrf.mxu1 }
 0x1c8   : > { %v3519_v14 = vpop.f32.mrf.mxu0  ;;  %v3521_v15 = vpop.f32.mrf.mxu1 }
 0x1ca   : > { %v3523_v16 = vpop.f32.mrf.mxu0  ;;  %v3525_v17 = vpop.f32.mrf.mxu1 }
 0x1cc   : > { %v3527_v18 = vpop.f32.mrf.mxu0  ;;  %v3529_v19 = vpop.f32.mrf.mxu1 }
 0x1ce   : > { %v3531_v20 = vpop.f32.mrf.mxu0  ;;  %v3533_v21 = vpop.f32.mrf.mxu1 }
 0x1d0   : > { %v3535_v24 = vpop.f32.mrf.mxu0  ;;  %v3537_v25 = vpop.f32.mrf.mxu1 }
 0x1d2   : > { %v3539_v27 = vpop.f32.mrf.mxu0  ;;  %v3541_v29 = vpop.f32.mrf.mxu1 }
 0x1d4   : > { %v3543_v30 = vpop.f32.mrf.mxu0  ;;  %v781_v34 = vpop.f32.mrf.mxu1 }
 0x1d6   : > { %v622_v35 = vpop.f32.mrf.mxu0  ;;  %v3545_v36 = vpop.f32.mrf.mxu1 }
 0x1d8   : > { %v626_v37 = vpop.f32.mrf.mxu0  ;;  %v787_v38 = vpop.f32.mrf.mxu1 }
 0x1da   : > { %v628_v41 = vpop.f32.mrf.mxu0  ;;  %v3547_v42 = vpop.f32.mrf.mxu1 }
 0x1dc   : > { %v632_v43 = vpop.f32.mrf.mxu0  ;;  %v793_v44 = vpop.f32.mrf.mxu1 }
 0x1de   : > { %v634_v45 = vpop.f32.mrf.mxu0  ;;  %v3549_v46 = vpop.f32.mrf.mxu1 }
 0x1e0   : > { %v638_v47 = vpop.f32.mrf.mxu0  ;;  %v799_v48 = vpop.f32.mrf.mxu1 }
 0x1e2   : > { %v640_v49 = vpop.f32.mrf.mxu0  ;;  %v3551_v50 = vpop.f32.mrf.mxu1 }
 0x1e4   : > { %v644_v51 = vpop.f32.mrf.mxu0  ;;  %v805_v52 = vpop.f32.mrf.mxu1 }
 0x1e6   : > { %v646_v53 = vpop.f32.mrf.mxu0  ;;  %v3553_v54 = vpop.f32.mrf.mxu1 }
 0x1e8   : > { %v650_v55 = vpop.f32.mrf.mxu0  ;;  %v811_v56 = vpop.f32.mrf.mxu1 }
 0x1ea   : > { %v652_v57 = vpop.f32.mrf.mxu0  ;;  %v3555_v58 = vpop.f32.mrf.mxu1 }
 0x1ec   : > { %v656_v59 = vpop.f32.mrf.mxu0  ;;  %v817_v60 = vpop.f32.mrf.mxu1 }
 0x1ed   : > { %2108 = vmatprep.subr.mxu0 %v817_v60 }
 0x1ee   : > { %v658_v22 = vpop.f32.mrf.mxu0  ;;  %2109 = vmatpush3.xpose.msra.mxu0 %v817_v60 }
 0x1ef   : > { %989 = vmatprep.subr.mxu1 %v658_v22  ;;  %2110 = vmatprep.subr.mxu0 %v811_v56 }
 0x1f0   : > { %990 = vmatpush1.xpose.msra.mxu1 %v656_v59  ;;  %v3557_v10 = vpop.f32.mrf.mxu0 }
 0x1f1   : > { %991 = vmatprep.subr.mxu1 %v652_v57  ;;  %v4244_v57 = vld [vmem:[#allocation30_spill] sm:$0xff] }
 0x1f2   : > { %2111 = vmatpush3.xpose.msra.mxu0 %v811_v56  ;;  %v3559_v26 = vpop.f32.mrf.mxu0 }
 0x1f3   : > { %2112 = vmatprep.subr.mxu0 %v805_v52 }
 0x1f4   : > { %992 = vmatpush1.xpose.msra.mxu1 %v650_v55  ;;  %v3561_v31 = vpop.f32.mrf.mxu0 }
 0x1f5   : > { %993 = vmatprep.subr.mxu1 %v646_v53  ;;  %v4243_v53 = vld [vmem:[#allocation69_spill] sm:$0xff] }
 0x1f6   : > { %2113 = vmatpush3.xpose.msra.mxu0 %v805_v52  ;;  %v3563_v0 = vpop.f32.mrf.mxu0 }
 0x1f7   : > { %2114 = vmatprep.subr.mxu0 %v799_v48 }
 0x1f8   : > { %994 = vmatpush1.xpose.msra.mxu1 %v644_v51  ;;  %v3565_v60 = vpop.f32.mrf.mxu0 }
 0x1f9   : > { %995 = vmatprep.subr.mxu1 %v640_v49  ;;  %v4240_v49 = vld [vmem:[#allocation52_spill] sm:$0xff] }
 0x1fa   : > { %2115 = vmatpush3.xpose.msra.mxu0 %v799_v48  ;;  %v3567_v59 = vpop.f32.mrf.mxu0 }
 0x1fb   : > { %2116 = vmatprep.subr.mxu0 %v793_v44 }
 0x1fc   : > { %996 = vmatpush1.xpose.msra.mxu1 %v638_v47  ;;  %v3569_v56 = vpop.f32.mrf.mxu0 }
 0x1fd   : > { %997 = vmatprep.subr.mxu1 %v634_v45  ;;  %v4233_v45 = vld [vmem:[#allocation43_spill] sm:$0xff] }
 0x1fe   : > { %2117 = vmatpush3.xpose.msra.mxu0 %v793_v44  ;;  %v3571_v55 = vpop.f32.mrf.mxu0 }
 0x1ff   : > { %2118 = vmatprep.subr.mxu0 %v787_v38 }
 0x200   : > { %998 = vmatpush1.xpose.msra.mxu1 %v632_v43  ;;  %v3573_v52 = vpop.f32.mrf.mxu0  ;;  %v4232_v43 = vld [vmem:[#allocation44_spill] sm:$0xff] }
 0x201   : > { %999 = vmatprep.subr.mxu1 %v628_v41  ;;  %v4231_v41 = vld [vmem:[#allocation40_spill] sm:$0xff] }
 0x202   : > { %2119 = vmatpush3.xpose.msra.mxu0 %v787_v38  ;;  %v3575_v51 = vpop.f32.mrf.mxu0 }
 0x203   : > { %2120 = vmatprep.subr.mxu0 %v781_v34 }
 0x204   : > { %1000 = vmatpush1.xpose.msra.mxu1 %v626_v37  ;;  %v3577_v48 = vpop.f32.mrf.mxu0  ;;  %v4230_v37 = vld [vmem:[#allocation54_spill] sm:$0xff] }
 0x205   : > { %1001 = vmatprep.subr.mxu1 %v622_v35 }
 0x206   : > { %2121 = vmatpush3.xpose.msra.mxu0 %v781_v34  ;;  %v3579_v47 = vpop.f32.mrf.mxu0 }
 0x207   : > { %2122 = vmatprep.subr.mxu0 %v3537_v25 }
 0x208   : > { %1002 = vmatpush1.xpose.msra.mxu1 %v3543_v30  ;;  %v3583_v44 = vpop.f32.mrf.mxu0  ;;  %v4229_v30 = vld [vmem:[#allocation41_spill] sm:$0xff] }
 0x209   : > { %1003 = vmatprep.subr.mxu1 %v3539_v27 }
 0x20a   : > { %2123 = vmatpush3.xpose.msra.mxu0 %v3537_v25  ;;  %v3587_v38 = vpop.f32.mrf.mxu0 }
 0x20b   : > { %2124 = vmatprep.subr.mxu0 %v3529_v19 }
 0x20c   : > { %1004 = vmatpush1.xpose.msra.mxu1 %v3535_v24  ;;  %v3591_v35 = vpop.f32.mrf.mxu0  ;;  %v4228_v24 = vld [vmem:[#allocation37_spill] sm:$0xff] }
 0x20d   : > { %1005 = vmatprep.subr.mxu1 %v3531_v20 }
 0x20e   : > { %2125 = vmatpush3.xpose.msra.mxu0 %v3529_v19  ;;  %v3595_v34 = vpop.f32.mrf.mxu0 }
 0x20f   : > { %2126 = vmatprep.subr.mxu0 %v3521_v15 }
 0x210   : > { %1006 = vmatpush1.xpose.msra.mxu1 %v3527_v18  ;;  %v3599_v27 = vpop.f32.mrf.mxu0  ;;  %v4227_v18 = vld [vmem:[#allocation51_spill] sm:$0xff] }
 0x211   : > { %1007 = vmatprep.subr.mxu1 %v3523_v16 }
 0x212   : > { %2127 = vmatpush3.xpose.msra.mxu0 %v3521_v15  ;;  %v3603_v25 = vpop.f32.mrf.mxu0 }
 0x213   : > { %2128 = vmatprep.subr.mxu0 %v3513_v11 }
 0x214   : > { %1008 = vmatpush1.xpose.msra.mxu1 %v3519_v14  ;;  %v942_v20 = vpop.f32.mrf.mxu0  ;;  %v4226_v14 = vld [vmem:[#allocation48_spill] sm:$0xff] }
 0x215   : > { %1009 = vmatprep.subr.mxu1 %v3515_v12 }
 0x216   : > { %2129 = vmatpush3.xpose.msra.mxu0 %v3513_v11  ;;  %v3609_v19 = vpop.f32.mrf.mxu0 }
 0x217   : > { %2130 = vmatprep.subr.mxu0 %v3505_v6 }
 0x218   : > { %1010 = vmatpush1.xpose.msra.mxu1 %v3511_v9  ;;  %v948_v16 = vpop.f32.mrf.mxu0  ;;  %v4225_v9 = vld [vmem:[#allocation38_spill] sm:$0xff] }
 0x219   : > { %1011 = vmatprep.subr.mxu1 %v3507_v7 }
 0x21a   : > { %2131 = vmatpush3.xpose.msra.mxu0 %v3505_v6  ;;  %v3615_v15 = vpop.f32.mrf.mxu0 }
 0x21b   : > { %2132 = vmatprep.subr.mxu0 %v3497_v2 }
 0x21c   : > { %1012 = vmatpush1.xpose.msra.mxu1 %v3503_v5  ;;  %v954_v12 = vpop.f32.mrf.mxu0  ;;  %v4220_v5 = vld [vmem:[#allocation31_spill] sm:$0xff] }
 0x21d   : > { %1013 = vmatprep.subr.mxu1 %v3499_v3 }
 0x21e   : > { %2133 = vmatpush3.xpose.msra.mxu0 %v3497_v2  ;;  %v3621_v11 = vpop.f32.mrf.mxu0 }
 0x21f   : > { %2134 = vmatprep.subr.mxu0 %v3489_v62 }
 0x220   : > { %1014 = vmatpush1.xpose.msra.mxu1 %v3495_v1  ;;  %v960_v7 = vpop.f32.mrf.mxu0  ;;  %v4218_v1 = vld [vmem:[#allocation36_spill] sm:$0xff] }
 0x221   : > { %1015 = vmatprep.subr.mxu1 %v3491_v63 }
 0x222   : > { %2135 = vmatpush3.xpose.msra.mxu0 %v3489_v62  ;;  %v3627_v6 = vpop.f32.mrf.mxu0 }
 0x223   : > { %2136 = vmatprep.subr.mxu0 %v3481_v33 }
 0x224   : > { %1016 = vmatpush1.xpose.msra.mxu1 %v3487_v61  ;;  %v966_v3 = vpop.f32.mrf.mxu0 }
 0x225   : > { %1017 = vmatprep.subr.mxu1 %v3483_v40  ;;  %v819_v40 = vpop.f32.mrf.mxu1 }
 0x226   : > { %2137 = vmatpush3.xpose.msra.mxu0 %v3481_v33  ;;  %v3633_v2 = vpop.f32.mrf.mxu0  ;;  %v4219_v33 = vld [vmem:[#allocation39_spill] sm:$0xff] }
 0x227   : > { %2138 = vmatprep.subr.mxu0 %v3473_v28 }
 0x228   : > { %1018 = vmatpush1.xpose.msra.mxu1 %v3479_v39  ;;  %v972_v63 = vpop.f32.mrf.mxu0  ;;  %v4221_v39 = vld [vmem:[#allocation35_spill] sm:$0xff] }
 0x229   : > { %1019 = vmatprep.subr.mxu1 %v3475_v32  ;;  %v4222_v32 = vld [vmem:[#allocation42_spill] sm:$0xff] }
 0x22a   : > { %2139 = vmatpush3.xpose.msra.mxu0 %v3473_v28  ;;  %v3639_v62 = vpop.f32.mrf.mxu0  ;;  %v4223_v28 = vld [vmem:[#allocation45_spill] sm:$0xff] }
 0x22c   : > { %1020 = vmatpush1.xpose.msra.mxu1 %v3471_v23  ;;  %v978_v61 = vpop.f32.mrf.mxu0  ;;  %v4224_v23 = vld [vmem:[#allocation34_spill] sm:$0xff] }
 0x22d   : > { %2141 = vmatmul.mubr.f32.vlgmr.msra.gmra.mxu0 %v4218_v1  ;;  %1456 = vmatprep.subr.mxu1 %v978_v61 }
 0x22e   : > { %2143 = vmatprep.mubr.f32.mxu0 %v4219_v33 }
 0x22f   : > { %1054 = vmatmul.mubr.f32.vlgmr.msra.gmra.mxu1 %v4220_v5 }
 0x230   : > { %1457 = vmatpush1.msra.mxu1 %v819_v40  ;;  %1058 = vmatprep.mubr.f32.mxu1 %v4221_v39  ;;  %v2695_v40 = vmov 0  }
 0x231   : > { %1458 = vmatprep.subr.mxu1 %v972_v63  ;;  %2144 = vmatmul.mubr.f32.gmra.mxu0 %v4222_v32 }
 0x232   : > { %1459 = vmatpush1.msra.mxu1 %v3555_v58  ;;  %2146 = vmatprep.mubr.f32.mxu0 %v4223_v28 }
 0x233   : > { %1059 = vmatmul.mubr.f32.gmra.mxu1 %v4224_v23  ;;  %1460 = vmatprep.subr.mxu1 %v966_v3 }
 0x234   : > { %1461 = vmatpush1.msra.mxu1 %v3553_v54  ;;  %1063 = vmatprep.mubr.f32.mxu1 %v4225_v9 }
 0x235   : > { %1462 = vmatprep.subr.mxu1 %v960_v7  ;;  %2147 = vmatmul.mubr.f32.gmra.mxu0 %v4226_v14 }
 0x236   : > { %1463 = vmatpush1.msra.mxu1 %v3551_v50  ;;  %2149 = vmatprep.mubr.f32.mxu0 %v4227_v18  ;;  %v3686_v50 = vpop.f32.mrf.mxu0 }
 0x237   : > { %1064 = vmatmul.mubr.f32.gmra.mxu1 %v4228_v24  ;;  %1464 = vmatprep.subr.mxu1 %v954_v12 }
 0x238   : > { %1465 = vmatpush1.msra.mxu1 %v3549_v46  ;;  %1068 = vmatprep.mubr.f32.mxu1 %v4229_v30  ;;  %v4234_v46 = vld [vmem:[#allocation47_spill] sm:$0xff] }
 0x239   : > { %1466 = vmatprep.subr.mxu1 %v948_v16  ;;  %2150 = vmatmul.mubr.f32.gmra.mxu0 %v4230_v37 }
 0x23a   : > { %1467 = vmatpush1.msra.mxu1 %v3547_v42  ;;  %v4235_v42 = vld [vmem:[#allocation46_spill] sm:$0xff]  ;;  %2364 = vset.pattern.permute.xlu0 %v2695_v40 }
 0x23b   : > { %1069 = vmatmul.mubr.f32.gmra.mxu1 %v4231_v41  ;;  %1468 = vmatprep.subr.mxu1 %v942_v20 }
 0x23c   : > { %1469 = vmatpush1.msra.mxu1 %v3545_v36  ;;  %1073 = vmatprep.mubr.f32.mxu1 %v4232_v43  ;;  %v4236_v36 = vld [vmem:[#allocation50_spill] sm:$0xff] }
 0x23d   : > { %1470 = vmatprep.subr.mxu1 %v3599_v27  ;;  %2365 = vset.pattern.permute.xlu1 %v2695_v40 }
 0x23e   : > { %1471 = vmatpush1.msra.mxu1 %v3541_v29  ;;  %v4237_v29 = vld [vmem:[#allocation49_spill] sm:$0xff] }
 0x23f   : > { %1074 = vmatmul.mubr.f32.gmra.mxu1 %v4233_v45  ;;  %1472 = vmatprep.subr.mxu1 %v3591_v35 }
 0x240   : > { %1473 = vmatpush1.msra.mxu1 %v3533_v21  ;;  %1078 = vmatprep.mubr.f32.mxu1 %v4234_v46  ;;  %v4238_v21 = vld [vmem:[#allocation53_spill] sm:$0xff] }
 0x241   : > { %1474 = vmatprep.subr.mxu1 %v3583_v44 }
 0x242   : > { %1475 = vmatpush1.msra.mxu1 %v3525_v17  ;;  %v4239_v17 = vld [vmem:[#allocation68_spill] sm:$0xff] }
 0x243   : > { %1079 = vmatmul.mubr.f32.gmra.mxu1 %v4235_v42  ;;  %1476 = vmatprep.subr.mxu1 %v3577_v48 }
 0x244   : > { %1477 = vmatpush1.msra.mxu1 %v3517_v13  ;;  %1083 = vmatprep.mubr.f32.mxu1 %v4236_v36  ;;  %v4241_v13 = vld [vmem:[#allocation67_spill] sm:$0xff] }
 0x245   : > { %1478 = vmatprep.subr.mxu1 %v3573_v52 }
 0x246   : > { %1479 = vmatpush1.msra.mxu1 %v3509_v8  ;;  %v4242_v8 = vmov 0.0  }
 0x247   : > { %1084 = vmatmul.mubr.f32.gmra.mxu1 %v4237_v29  ;;  %1480 = vmatprep.subr.mxu1 %v3569_v56 }
 0x248   : > { %1481 = vmatpush1.msra.mxu1 %v3501_v4  ;;  %1088 = vmatprep.mubr.f32.mxu1 %v4238_v21  ;;  %v1199_v21 = vld [vmem:[#allocation2] sm:$0xff] }
 0x249   : > { %1482 = vmatprep.subr.mxu1 %v3565_v60 }
 0x24a   : > { %1483 = vmatpush1.msra.mxu1 %v4239_v17 }
 0x24b   : > { %1089 = vmatmul.mubr.f32.gmra.mxu1 %v4240_v49  ;;  %1484 = vmatprep.subr.mxu1 %v3561_v31 }
 0x24c   : > { %1485 = vmatpush1.msra.mxu1 %v4241_v13  ;;  %1520 = vmatprep.mubr.f32.mxu1 %v4242_v8  ;;  %v1200_v13 = vld [vmem:[#allocation2 + $0x8] sm:$0xff] }
 0x24d   : > { %1486 = vmatprep.subr.mxu1 %v3557_v10 }
 0x24e   : > { %1487 = vmatpush1.msra.mxu1 %v4243_v53 }
 0x24f   : > { %2152 = vmatprep.subr.mxu1 %v3686_v50 }
 0x2ed   : > { %v2142_v4 = vpop.f32.mrf.mxu0 }
 0x2ef   : > { %v1055_v54 = vpop.f32.mrf.mxu1  ;;  %v1160_v22 = vpop.f32.mrf.mxu0 }
 0x2f0   : > { %v1056_v58 = vadd.f32 %v4244_v57, %v1055_v54 }
 0x2f1   : > { %v1057_v60 = vpop.f32.mrf.mxu1  ;;  %v2145_v44 = vpop.f32.mrf.mxu0 }
 0x2f2   : > { %v3693_v56 = vadd.f32 %v1160_v22, %v1056_v58 }
 0x2f3   : > { %v1060_v31 = vpop.f32.mrf.mxu1  ;;  %v1170_v20 = vpop.f32.mrf.mxu0 }
 0x2f4   : > { %v1061_v52 = vadd.f32 %v4244_v57, %v1060_v31  ;;  %1207 = vmax.xlane.f32.xlu0 %v3693_v56  ;;  %v1202_v31 = vld [vmem:[#allocation2 + $0x18] sm:$0xff] }
 0x2f5   : > { %v1062_v48 = vpop.f32.mrf.mxu1  ;;  %v2148_v61 = vpop.f32.mrf.mxu0 }
 0x2f6   : > { %v3697_v10 = vadd.f32 %v2142_v4, %v1061_v52 }
 0x2f7   : > { %v1065_v35 = vpop.f32.mrf.mxu1  ;;  %v1180_v39 = vpop.f32.mrf.mxu0 }
 0x2f8   : > { %v1066_v27 = vadd.f32 %v4244_v57, %v1065_v35  ;;  %1209 = vmax.xlane.f32.xlu0 %v3697_v10  ;;  %v1203_v35 = vld [vmem:[#allocation2 + $0x20] sm:$0xff] }
 0x2f9   : > { %v1067_v16 = vpop.f32.mrf.mxu1  ;;  %v2151_v18 = vpop.f32.mrf.mxu0 }
 0x2fa   : > { %v3701_v12 = vadd.f32 %v1170_v20, %v1066_v27 }
 0x2fb   : > { %v1070_v7 = vpop.f32.mrf.mxu1  ;;  %v1190_v41 = vpop.f32.mrf.mxu0 }
 0x2fc   : > { %v1071_v3 = vadd.f32 %v4244_v57, %v1070_v7  ;;  %1211 = vmax.xlane.f32.xlu1 %v3701_v12 }
 0x2fd   : > { %v1072_v63 = vpop.f32.mrf.mxu1 }
 0x2fe   : > { %v3705_v1 = vadd.f32 %v2145_v44, %v1071_v3 }
 0x2ff   : > { %v1075_v33 = vpop.f32.mrf.mxu1 }
 0x300   : > { %v1076_v5 = vadd.f32 %v4244_v57, %v1075_v33  ;;  %1213 = vmax.xlane.f32.xlu1 %v3705_v1 }
 0x301   : > { %v1077_v32 = vpop.f32.mrf.mxu1 }
 0x302   : > { %v3709_v28 = vadd.f32 %v1180_v39, %v1076_v5 }
 0x303   : > { %v1080_v23 = vpop.f32.mrf.mxu1 }
 0x304   : > { %v1081_v9 = vadd.f32 %v4244_v57, %v1080_v23  ;;  %1215 = vmax.xlane.f32.xlu0 %v3709_v28  ;;  %v3732_v23 = vld [vmem:[#allocation2 + $0x30] sm:$0xff] }
 0x305   : > { %v1082_v14 = vpop.f32.mrf.mxu1 }
 0x306   : > { %v3713_v24 = vadd.f32 %v2148_v61, %v1081_v9  ;;  %v1204_v61 = vld [vmem:[#allocation2 + $0x28] sm:$0xff] }
 0x307   : > { %v1085_v30 = vpop.f32.mrf.mxu1 }
 0x308   : > { %v1086_v37 = vadd.f32 %v4244_v57, %v1085_v30  ;;  %1217 = vmax.xlane.f32.xlu1 %v3713_v24 }
 0x309   : > { %v1087_v43 = vpop.f32.mrf.mxu1 }
 0x30a   : > { %v3717_v45 = vadd.f32 %v1190_v41, %v1086_v37  ;;  %v3738_v41 = vld [vmem:[#allocation2 + $0x38] sm:$0xff] }
 0x30b   : > { %v1090_v46 = vpop.f32.mrf.mxu1 }
 0x30c   : > { %v1091_v42 = vadd.f32 %v4244_v57, %v1090_v46  ;;  %1219 = vmax.xlane.f32.xlu0 %v3717_v45  ;;  %v1201_v57 = vld [vmem:[#allocation2 + $0x10] sm:$0xff] }
 0x30d   : > { %v1092_v36 = vpop.f32.mrf.mxu1 }
 0x30e   : > { %v3721_v29 = vadd.f32 %v2151_v18, %v1091_v42 }
 0x310   : > { %1221 = vmax.xlane.f32.xlu1 %v3721_v29 }
 0x37d   : > { %v1208_v17 = vpop.xlane.xlu0 %1207 }
 0x37e   : > { %v1223_v49 = vmax.f32 %v1199_v21, %v1208_v17 }
 0x380   : > { %v1231_v53 = vsub.f32 %v1199_v21, %v1223_v49  ;;  %1722 = vst.msk [vmem:[#allocation2] sm:$0xff] %vm1359_vm1, %v1223_v49  ;;  %1257 = vperm.xlu0 %2364, %v1223_v49  }
 0x381   : > { %v1210_v4 = vpop.xlane.xlu0 %1209 }
 0x382   : > { %v1239_v54 = vmul.f32 1.442695, %v1231_v53  ;;  %v1224_v58 = vmax.f32 %v1200_v13, %v1210_v4 }
 0x384   : > { %2366 = vpow2.f32 %v1239_v54  ;;  %1723 = vst.msk [vmem:[#allocation2 + $0x8] sm:$0xff] %vm1359_vm1, %v1224_v58  ;;  %1262 = vperm.xlu1 %2365, %v1224_v58   ;;  %v1232_v48 = vsub.f32 %v1200_v13, %v1224_v58 }
 0x385   : > { %v1212_v22 = vpop.xlane.xlu1 %1211 }
 0x386   : > { %v1225_v60 = vmax.f32 %v1201_v57, %v1212_v22  ;;  %v1241_v16 = vmul.f32 1.442695, %v1232_v48 }
 0x388   : > { %1724 = vst.msk [vmem:[#allocation2 + $0x10] sm:$0xff] %vm1359_vm1, %v1225_v60  ;;  %1267 = vperm.xlu1 %2365, %v1225_v60   ;;  %v1233_v7 = vsub.f32 %v1201_v57, %v1225_v60 }
 0x389   : > { %v1214_v52 = vpop.xlane.xlu1 %1213 }
 0x38a   : > { %v1226_v44 = vmax.f32 %v1202_v31, %v1214_v52  ;;  %v1243_v5 = vmul.f32 1.442695, %v1233_v7 }
 0x38c   : > { %v1234_v27 = vsub.f32 %v1202_v31, %v1226_v44  ;;  %1725 = vst.msk [vmem:[#allocation2 + $0x18] sm:$0xff] %vm1359_vm1, %v1226_v44  ;;  %1272 = vperm.xlu1 %2365, %v1226_v44  }
 0x38d   : > { %v1216_v20 = vpop.xlane.xlu0 %1215 }
 0x38e   : > { %v1245_v3 = vmul.f32 1.442695, %v1234_v27  ;;  %v1227_v63 = vmax.f32 %v1203_v35, %v1216_v20 }
 0x390   : > { %2368 = vpow2.f32 %v1245_v3  ;;  %1726 = vst.msk [vmem:[#allocation2 + $0x20] sm:$0xff] %vm1359_vm1, %v1227_v63  ;;  %1277 = vperm.xlu1 %2365, %v1227_v63   ;;  %v1235_v39 = vsub.f32 %v1203_v35, %v1227_v63 }
 0x391   : > { %v3729_v33 = vpop.eup %2366  ;;  %v1218_v40 = vpop.xlane.xlu1 %1217  ;;  %2370 = vpow2.f32 %v1241_v16 }
 0x392   : > { %v1228_v32 = vmax.f32 %v1204_v61, %v1218_v40  ;;  %1394 = vperm.xlu0 %2364, %v3729_v33   ;;  %2372 = vpow2.f32 %v1243_v5  ;;  %v1247_v18 = vmul.f32 1.442695, %v1235_v39  ;;  %v1320_v39 = vld [vmem:[#allocation3 + $0x8] sm:$0xff] }
 0x394   : > { %v1236_v9 = vsub.f32 %v1204_v61, %v1228_v32  ;;  %1727 = vst.msk [vmem:[#allocation2 + $0x28] sm:$0xff] %vm1359_vm1, %v1228_v32  ;;  %1282 = vperm.xlu1 %2365, %v1228_v32  }
 0x395   : > { %v1220_v14 = vpop.xlane.xlu0 %1219 }
 0x396   : > { %v1249_v30 = vmul.f32 1.442695, %v1236_v9  ;;  %v3736_v37 = vmax.f32 %v3732_v23, %v1220_v14  ;;  %v1321_v14 = vld [vmem:[#allocation3 + $0x10] sm:$0xff] }
 0x398   : > { %2374 = vpow2.f32 %v1249_v30  ;;  %v1237_v43 = vsub.f32 %v3732_v23, %v3736_v37  ;;  %1728 = vst.msk [vmem:[#allocation2 + $0x30] sm:$0xff] %vm1359_vm1, %v3736_v37  ;;  %1287 = vperm.xlu1 %2365, %v3736_v37  }
 0x399   : > { %v1222_v46 = vpop.xlane.xlu1 %1221  ;;  %2376 = vpow2.f32 %v1247_v18 }
 0x39a   : > { %v3746_v42 = vmax.f32 %v3738_v41, %v1222_v46 }
 0x39c   : > { %v1238_v36 = vsub.f32 %v3738_v41, %v3746_v42  ;;  %1729 = vst.msk [vmem:[#allocation2 + $0x38] sm:$0xff] %vm1359_vm1, %v3746_v42  ;;  %1292 = vperm.xlu1 %2365, %v3746_v42   ;;  %v1322_v41 = vld [vmem:[#allocation3 + $0x18] sm:$0xff]  ;;  %v1323_v42 = vld [vmem:[#allocation3 + $0x20] sm:$0xff] }
 0x39d   : > { %v3753_v21 = vpop.eup %2368 }
 0x39e   : > { %1409 = vperm.xlu0 %2364, %v3753_v21   ;;  %v3756_v17 = vpop.eup %2370 }
 0x39f   : > { %v3759_v49 = vpop.eup %2372  ;;  %v1328_v23 = vmul.f32 %v3756_v17, %v1320_v39 }
 0x3a0   : > { %1399 = vperm.xlu1 %2365, %v3756_v17   ;;  %v1329_v30 = vmul.f32 %v3759_v49, %v1321_v14 }
 0x3a4   : > { %1404 = vperm.xlu1 %2365, %v3759_v49  }
 0x3a5   : > { %v3762_v13 = vpop.eup %2374 }
 0x3a6   : > { %1419 = vperm.xlu0 %2364, %v3762_v13   ;;  %v3765_v53 = vpop.eup %2376 }
 0x3a7   : > { %v1331_v17 = vmul.f32 %v3765_v53, %v1323_v42 }
 0x3a8   : > { %1414 = vperm.xlu1 %2365, %v3765_v53  }
 0x3fb   : > { %v1258_v4 = vpop.permute.xlu0 %1257 }
 0x3fc   : > { %v1295_v54 = vsub.f32 %v3693_v56, %v1258_v4 }
 0x3fe   : > { %v1303_v58 = vmul.f32 1.442695, %v1295_v54  ;;  %v1324_v54 = vld [vmem:[#allocation3 + $0x28] sm:$0xff] }
 0x3ff   : > { %v1263_v57 = vpop.permute.xlu1 %1262  ;;  %v1332_v49 = vmul.f32 %v3762_v13, %v1324_v54 }
 0x400   : > { %2378 = vpow2.f32 %v1303_v58  ;;  %v1296_v22 = vsub.f32 %v3697_v10, %v1263_v57 }
 0x402   : > { %v1305_v60 = vmul.f32 1.442695, %v1296_v22  ;;  %v1325_v22 = vld [vmem:[#allocation3 + $0x30] sm:$0xff] }
 0x403   : > { %v1268_v31 = vpop.permute.xlu1 %1267 }
 0x404   : > { %2380 = vpow2.f32 %v1305_v60  ;;  %v1297_v52 = vsub.f32 %v3701_v12, %v1268_v31 }
 0x406   : > { %v1307_v48 = vmul.f32 1.442695, %v1297_v52  ;;  %v1326_v52 = vld [vmem:[#allocation3 + $0x38] sm:$0xff] }
 0x407   : > { %v1273_v44 = vpop.permute.xlu1 %1272 }
 0x408   : > { %2382 = vpow2.f32 %v1307_v48  ;;  %v1298_v35 = vsub.f32 %v3705_v1, %v1273_v44 }
 0x40a   : > { %v1309_v27 = vmul.f32 1.442695, %v1298_v35 }
 0x40b   : > { %v1278_v20 = vpop.permute.xlu1 %1277 }
 0x40c   : > { %2384 = vpow2.f32 %v1309_v27  ;;  %v1299_v56 = vsub.f32 %v3709_v28, %v1278_v20  ;;  %v1368_v27 = vld [vmem:[#allocation4 + $0xb0] sm:$0xff]  ;;  %v1369_v20 = vld [vmem:[#allocation4] sm:$0xff] }
 0x40d   : > { %v3773_v16 = vpop.eup %2378 }
 0x40e   : > { %v1311_v7 = vmul.f32 1.442695, %v1299_v56  ;;  %1335 = vadd.xlane.f32.xlu1 %v3773_v16  ;;  %1521 = vmatmul.mubr.f32.vlgmr.msra.gmra.mxu1 %v3773_v16 }
 0x40f   : > { %2153 = vmatpush3.msra.mxu1 %v3686_v50  ;;  %v1283_v10 = vpop.permute.xlu1 %1282  ;;  %1526 = vmatprep.mubr.f32.mxu1 %v4242_v8 }
 0x410   : > { %2386 = vpow2.f32 %v1311_v7  ;;  %v1300_v12 = vsub.f32 %v3713_v24, %v1283_v10  ;;  %2154 = vmatprep.subr.mxu1 %v3639_v62  ;;  %v1371_v10 = vld [vmem:[#allocation4 + $0x48] sm:$0xff] }
 0x411   : > { %v3781_v1 = vpop.eup %2380  ;;  %2155 = vmatpush3.msra.mxu1 %v3639_v62 }
 0x412   : > { %v1313_v28 = vmul.f32 1.442695, %v1300_v12  ;;  %2156 = vmatprep.subr.mxu1 %v3633_v2  ;;  %1337 = vadd.xlane.f32.xlu0 %v3781_v1 }
 0x413   : > { %1527 = vmatmul.mubr.f32.gmra.mxu1 %v3781_v1  ;;  %v1288_v50 = vpop.permute.xlu1 %1287 }
 0x414   : > { %2388 = vpow2.f32 %v1313_v28  ;;  %2157 = vmatpush3.msra.mxu1 %v3633_v2  ;;  %v1301_v3 = vsub.f32 %v3717_v45, %v1288_v50  ;;  %1532 = vmatprep.mubr.f32.mxu1 %v4242_v8  ;;  %v1372_v28 = vld [vmem:[#allocation4 + $0x60] sm:$0xff] }
 0x415   : > { %v2383_v24 = vpop.eup %2382  ;;  %2158 = vmatprep.subr.mxu1 %v3627_v6 }
 0x416   : > { %v1315_v63 = vmul.f32 1.442695, %v1301_v3  ;;  %2159 = vmatpush3.msra.mxu1 %v3627_v6  ;;  %1339 = vadd.xlane.f32.xlu0 %v2383_v24 }
 0x417   : > { %2160 = vmatprep.subr.mxu1 %v3621_v11  ;;  %1533 = vmatmul.mubr.f32.gmra.mxu1 %v2383_v24  ;;  %v1293_v62 = vpop.permute.xlu1 %1292 }
 0x418   : > { %2390 = vpow2.f32 %v1315_v63  ;;  %2161 = vmatpush3.msra.mxu1 %v3621_v11  ;;  %v1302_v2 = vsub.f32 %v3721_v29, %v1293_v62  ;;  %1538 = vmatprep.mubr.f32.mxu1 %v4242_v8 }
 0x419   : > { %v2385_v45 = vpop.eup %2384  ;;  %2162 = vmatprep.subr.mxu1 %v3615_v15 }
 0x41a   : > { %v1317_v61 = vmul.f32 1.442695, %v1302_v2  ;;  %2163 = vmatpush3.msra.mxu1 %v3615_v15  ;;  %1341 = vadd.xlane.f32.xlu1 %v2385_v45 }
 0x41b   : > { %2164 = vmatprep.subr.mxu1 %v3609_v19  ;;  %1539 = vmatmul.mubr.f32.gmra.mxu1 %v2385_v45 }
 0x41c   : > { %2392 = vpow2.f32 %v1317_v61  ;;  %2165 = vmatpush3.msra.mxu1 %v3609_v19  ;;  %1544 = vmatprep.mubr.f32.mxu1 %v4242_v8  ;;  %v3834_v19 = vpop.permute.xlu0 %1394 }
 0x41d   : > { %v2387_v11 = vpop.eup %2386  ;;  %2166 = vmatprep.subr.mxu1 %v3603_v25  ;;  %v1432_v13 = vmul.f32 %v3834_v19, %v1368_v27  ;;  %v1433_v7 = vmul.f32 %v3834_v19, %v1369_v20 }
 0x41e   : > { %2167 = vmatpush3.msra.mxu1 %v3603_v25  ;;  %1343 = vadd.xlane.f32.xlu0 %v2387_v11 }
 0x41f   : > { %2168 = vmatprep.subr.mxu1 %v3595_v34  ;;  %1545 = vmatmul.mubr.f32.gmra.mxu1 %v2387_v11 }
 0x420   : > { %2169 = vmatpush3.msra.mxu1 %v3595_v34  ;;  %1550 = vmatprep.mubr.f32.mxu1 %v4242_v8  ;;  %v1253_v34 = vmul.f32 1.442695, %v1238_v36  ;;  %v3836_v6 = vpop.permute.xlu0 %1409 }
 0x421   : > { %v2389_v15 = vpop.eup %2388  ;;  %2170 = vmatprep.subr.mxu1 %v3587_v38 }
 0x422   : > { %2171 = vmatpush3.msra.mxu1 %v3587_v38  ;;  %1345 = vadd.xlane.f32.xlu1 %v2389_v15 }
 0x423   : > { %2172 = vmatprep.subr.mxu1 %v3579_v47  ;;  %1551 = vmatmul.mubr.f32.gmra.mxu1 %v2389_v15 }
 0x424   : > { %2173 = vmatpush3.msra.mxu1 %v3579_v47  ;;  %1556 = vmatprep.mubr.f32.mxu1 %v4242_v8  ;;  %v1251_v47 = vmul.f32 1.442695, %v1237_v43  ;;  %v3841_v40 = vpop.permute.xlu0 %1419 }
 0x425   : > { %v2391_v25 = vpop.eup %2390  ;;  %2174 = vmatprep.subr.mxu1 %v3575_v51 }
 0x426   : > { %2175 = vmatpush3.msra.mxu1 %v3575_v51  ;;  %1347 = vadd.xlane.f32.xlu0 %v2391_v25  ;;  %2394 = vpow2.f32 %v1251_v47 }
 0x427   : > { %2176 = vmatprep.subr.mxu1 %v3571_v55  ;;  %1557 = vmatmul.mubr.f32.gmra.mxu1 %v2391_v25  ;;  %2396 = vpow2.f32 %v1253_v34 }
 0x428   : > { %2177 = vmatpush3.msra.mxu1 %v3571_v55  ;;  %1562 = vmatprep.mubr.f32.mxu1 %v4242_v8  ;;  %v1319_v8 = vld [vmem:[#allocation3] sm:$0xff] }
 0x429   : > { %v2393_v38 = vpop.eup %2392  ;;  %2178 = vmatprep.subr.mxu1 %v3567_v59  ;;  %v1327_v29 = vmul.f32 %v3729_v33, %v1319_v8  ;;  %v1330_v33 = vmul.f32 %v3753_v21, %v1322_v41 }
 0x42a   : > { %2179 = vmatpush3.msra.mxu1 %v3567_v59  ;;  %1349 = vadd.xlane.f32.xlu1 %v2393_v38 }
 0x42b   : > { %2180 = vmatprep.subr.mxu1 %v3563_v0  ;;  %1563 = vmatmul.mubr.f32.gmra.mxu1 %v2393_v38 }
 0x42c   : > { %2181 = vmatpush3.msra.mxu1 %v3563_v0  ;;  %2184 = vmatprep.mubr.f32.mxu1 %v3773_v16  ;;  %v3830_v0 = vpop.permute.xlu1 %1399 }
 0x42d   : > { %2182 = vmatprep.subr.mxu1 %v3559_v26  ;;  %v1435_v50 = vmul.f32 %v3830_v0, %v1371_v10  ;;  %v1436_v62 = vmul.f32 %v3830_v0, %v1372_v28 }
 0x42e   : > { %2183 = vmatpush3.msra.mxu1 %v3559_v26 }
 0x42f   : > { %2185 = vmatmul.mubr.f32.vlgmr.msra.gmra.mxu1 %v3781_v1 }
 0x430   : > { %2187 = vmatprep.mubr.f32.mxu1 %v2383_v24  ;;  %v3832_v51 = vpop.permute.xlu1 %1404  ;;  %v1374_v24 = vld [vmem:[#allocation4 + $0x40] sm:$0xff] }
 0x433   : > { %2188 = vmatmul.mubr.f32.gmra.mxu1 %v2385_v45  ;;  %v2395_v59 = vpop.eup %2394  ;;  %v1375_v45 = vld [vmem:[#allocation4 + $0x78] sm:$0xff] }
 0x434   : > { %2190 = vmatprep.mubr.f32.mxu1 %v2387_v11  ;;  %v2397_v55 = vpop.eup %2396  ;;  %v3838_v26 = vpop.permute.xlu1 %1414  ;;  %v1333_v21 = vmul.f32 %v2395_v59, %v1325_v22  ;;  %v1438_v11 = vmul.f32 %v3832_v51, %v1374_v24  ;;  %v1439_v47 = vmul.f32 %v3832_v51, %v1375_v45  ;;  %v1379_v24 = vld [vmem:[#allocation4 + $0x98] sm:$0xff]  ;;  %v1376_v45 = vld [vmem:[#allocation4 + $0x88] sm:$0xff] }
 0x435   : > { %v1334_v44 = vmul.f32 %v2397_v55, %v1326_v52 }
 0x437   : > { %2191 = vmatmul.mubr.f32.gmra.mxu1 %v2389_v15 }
 0x438   : > { %2193 = vmatprep.mubr.f32.mxu1 %v2391_v25  ;;  %v1377_v25 = vld [vmem:[#allocation4 + $0x90] sm:$0xff] }
 0x439   : > { %v1441_v8 = vmul.f32 %v3836_v6, %v1377_v25  ;;  %v1385_v25 = vld [vmem:[#allocation4 + $0x68] sm:$0xff] }
 0x43b   : > { %2194 = vmatmul.mubr.f32.gmra.mxu1 %v2393_v38  ;;  %1424 = vperm.xlu1 %2365, %v2395_v59   ;;  %v1378_v59 = vld [vmem:[#allocation4 + $0x18] sm:$0xff] }
 0x43c   : > { %1429 = vperm.xlu0 %2364, %v2397_v55  }
 0x497   : > { %v1336_v5 = vpop.xlane.xlu1 %1335 }
 0x498   : > { %v1351_v32 = vadd.f32 %v1336_v5, %v1327_v29  ;;  %v1380_v5 = vld [vmem:[#allocation4 + $0x38] sm:$0xff] }
 0x49a   : > { %1360 = vst.msk [vmem:[#allocation3] sm:$0xff] %vm1359_vm1, %v1351_v32  ;;  %v1442_v32 = vmul.f32 %v3836_v6, %v1378_v59 }
 0x49b   : > { %v1338_v9 = vpop.xlane.xlu0 %1337 }
 0x49c   : > { %v1352_v18 = vadd.f32 %v1338_v9, %v1328_v23  ;;  %v1381_v9 = vld [vmem:[#allocation4 + $0x50] sm:$0xff] }
 0x49e   : > { %1361 = vst.msk [vmem:[#allocation3 + $0x8] sm:$0xff] %vm1359_vm1, %v1352_v18  ;;  %v1444_v18 = vmul.f32 %v3838_v26, %v1380_v5 }
 0x49f   : > { %v1340_v37 = vpop.xlane.xlu0 %1339 }
 0x4a0   : > { %v1353_v43 = vadd.f32 %v1340_v37, %v1329_v30  ;;  %v1383_v37 = vld [vmem:[#allocation4 + $0xa0] sm:$0xff] }
 0x4a2   : > { %1362 = vst.msk [vmem:[#allocation3 + $0x10] sm:$0xff] %vm1359_vm1, %v1353_v43  ;;  %v1445_v43 = vmul.f32 %v3838_v26, %v1381_v9 }
 0x4a3   : > { %v1342_v46 = vpop.xlane.xlu1 %1341 }
 0x4a4   : > { %v1354_v36 = vadd.f32 %v1342_v46, %v1330_v33  ;;  %v1384_v46 = vld [vmem:[#allocation4 + $0xa8] sm:$0xff] }
 0x4a6   : > { %1363 = vst.msk [vmem:[#allocation3 + $0x18] sm:$0xff] %vm1359_vm1, %v1354_v36  ;;  %v1447_v36 = vmul.f32 %v3841_v40, %v1383_v37 }
 0x4a7   : > { %v1344_v4 = vpop.xlane.xlu0 %1343 }
 0x4a8   : > { %v1355_v58 = vadd.f32 %v1344_v4, %v1331_v17  ;;  %v1386_v17 = vld [vmem:[#allocation4 + $0x30] sm:$0xff] }
 0x4aa   : > { %1364 = vst.msk [vmem:[#allocation3 + $0x20] sm:$0xff] %vm1359_vm1, %v1355_v58 }
 0x4ab   : > { %v1346_v57 = vpop.xlane.xlu1 %1345 }
 0x4ac   : > { %v1356_v60 = vadd.f32 %v1346_v57, %v1332_v49  ;;  %v1448_v49 = vmul.f32 %v3841_v40, %v1384_v46  ;;  %v1387_v57 = vld [vmem:[#allocation4 + $0x58] sm:$0xff] }
 0x4ae   : > { %1365 = vst.msk [vmem:[#allocation3 + $0x28] sm:$0xff] %vm1359_vm1, %v1356_v60 }
 0x4af   : > { %v1348_v31 = vpop.xlane.xlu0 %1347 }
 0x4b0   : > { %v1357_v48 = vadd.f32 %v1348_v31, %v1333_v21  ;;  %v1389_v31 = vld [vmem:[#allocation4 + $0xb8] sm:$0xff] }
 0x4b2   : > { %1366 = vst.msk [vmem:[#allocation3 + $0x30] sm:$0xff] %vm1359_vm1, %v1357_v48 }
 0x4b3   : > { %v1350_v53 = vpop.xlane.xlu1 %1349 }
 0x4b4   : > { %v1358_v35 = vadd.f32 %v1350_v53, %v1334_v44 }
 0x4b6   : > { %1367 = vst.msk [vmem:[#allocation3 + $0x38] sm:$0xff] %vm1359_vm1, %v1358_v35  ;;  %v1390_v35 = vld [vmem:[#allocation4 + $0x20] sm:$0xff] }
 0x4b7   : > { %v1425_v4 = vpop.permute.xlu1 %1424  ;;  %v1430_v52 = vpop.permute.xlu0 %1429 }
 0x4b8   : > { %v1450_v60 = vmul.f32 %v1425_v4, %v1386_v17  ;;  %v1451_v44 = vmul.f32 %v1425_v4, %v1387_v57  ;;  %v1453_v20 = vmul.f32 %v1430_v52, %v1389_v31 }
 0x4ce   : > { %v1522_v56 = vpop.f32.mrf.mxu1 }
 0x4cf   : > { %v1674_v16 = vadd.f32 %v1522_v56, %v1432_v13 }
 0x4d0   : > { %v1524_v12 = vpop.f32.mrf.mxu1 }
 0x4d1   : > { %1698 = vst [vmem:[#allocation4 + $0xb0] sm:$0xff] %v1674_v16  ;;  %v1675_v1 = vadd.f32 %v1524_v12, %v1433_v7  ;;  %v1373_v16 = vld [vmem:[#allocation4 + $0x28] sm:$0xff]  ;;  %v1454_v7 = vmul.f32 %v1430_v52, %v1390_v35 }
 0x4d3   : > { %1699 = vst [vmem:[#allocation4] sm:$0xff] %v1675_v1  ;;  %v1528_v3 = vpop.f32.mrf.mxu1  ;;  %v1370_v1 = vld [vmem:[#allocation4 + $0x10] sm:$0xff] }
 0x4d4   : > { %v1677_v63 = vadd.f32 %v1528_v3, %v1435_v50  ;;  %v1437_v50 = vmul.f32 %v3830_v0, %v1373_v16  ;;  %v1382_v0 = vld [vmem:[#allocation4 + $0x70] sm:$0xff] }
 0x4d5   : > { %v1530_v2 = vpop.f32.mrf.mxu1  ;;  %v1446_v5 = vmul.f32 %v3838_v26, %v1382_v0 }
 0x4d6   : > { %1701 = vst [vmem:[#allocation4 + $0x48] sm:$0xff] %v1677_v63  ;;  %v1678_v61 = vadd.f32 %v1530_v2, %v1436_v62  ;;  %v1434_v62 = vmul.f32 %v3834_v19, %v1370_v1 }
 0x4d7   : > { %v1534_v15 = vpop.f32.mrf.mxu1 }
 0x4d8   : > { %1702 = vst [vmem:[#allocation4 + $0x60] sm:$0xff] %v1678_v61  ;;  %v1680_v38 = vadd.f32 %v1534_v15, %v1438_v11  ;;  %v1443_v11 = vmul.f32 %v3836_v6, %v1379_v24 }
 0x4d9   : > { %v1536_v34 = vpop.f32.mrf.mxu1 }
 0x4da   : > { %1704 = vst [vmem:[#allocation4 + $0x40] sm:$0xff] %v1680_v38  ;;  %v1681_v55 = vadd.f32 %v1536_v34, %v1439_v47  ;;  %v1440_v47 = vmul.f32 %v3832_v51, %v1376_v45 }
 0x4db   : > { %v1540_v29 = vpop.f32.mrf.mxu1 }
 0x4dc   : > { %1705 = vst [vmem:[#allocation4 + $0x78] sm:$0xff] %v1681_v55  ;;  %v1683_v39 = vadd.f32 %v1540_v29, %v1441_v8  ;;  %v1449_v55 = vmul.f32 %v3841_v40, %v1385_v25  ;;  %v1391_v8 = vld [vmem:[#allocation4 + $0x8] sm:$0xff] }
 0x4dd   : > { %v1542_v23 = vpop.f32.mrf.mxu1 }
 0x4de   : > { %1707 = vst [vmem:[#allocation4 + $0x90] sm:$0xff] %v1683_v39  ;;  %v1684_v14 = vadd.f32 %v1542_v23, %v1442_v32  ;;  %v1388_v39 = vld [vmem:[#allocation4 + $0x80] sm:$0xff]  ;;  %v1455_v32 = vmul.f32 %v1430_v52, %v1391_v8 }
 0x4df   : > { %v1546_v30 = vpop.f32.mrf.mxu1 }
 0x4e0   : > { %1708 = vst [vmem:[#allocation4 + $0x18] sm:$0xff] %v1684_v14  ;;  %v1686_v41 = vadd.f32 %v1546_v30, %v1444_v18  ;;  %v1452_v14 = vmul.f32 %v1425_v4, %v1388_v39 }
 0x4e1   : > { %v1548_v33 = vpop.f32.mrf.mxu1 }
 0x4e2   : > { %1710 = vst [vmem:[#allocation4 + $0x38] sm:$0xff] %v1686_v41  ;;  %v1687_v42 = vadd.f32 %v1548_v33, %v1445_v43 }
 0x4e3   : > { %v1552_v54 = vpop.f32.mrf.mxu1 }
 0x4e4   : > { %1711 = vst [vmem:[#allocation4 + $0x50] sm:$0xff] %v1687_v42  ;;  %v1689_v58 = vadd.f32 %v1552_v54, %v1447_v36 }
 0x4e5   : > { %v1554_v22 = vpop.f32.mrf.mxu1 }
 0x4e6   : > { %1713 = vst [vmem:[#allocation4 + $0xa0] sm:$0xff] %v1689_v58  ;;  %v1690_v21 = vadd.f32 %v1554_v22, %v1448_v49 }
 0x4e7   : > { %v1558_v48 = vpop.f32.mrf.mxu1 }
 0x4e8   : > { %1714 = vst [vmem:[#allocation4 + $0xa8] sm:$0xff] %v1690_v21  ;;  %v1692_v53 = vadd.f32 %v1558_v48, %v1450_v60 }
 0x4e9   : > { %v1560_v27 = vpop.f32.mrf.mxu1 }
 0x4ea   : > { %1716 = vst [vmem:[#allocation4 + $0x30] sm:$0xff] %v1692_v53  ;;  %v1693_v13 = vadd.f32 %v1560_v27, %v1451_v44 }
 0x4eb   : > { %v1564_v56 = vpop.f32.mrf.mxu1 }
 0x4ec   : > { %1717 = vst [vmem:[#allocation4 + $0x58] sm:$0xff] %v1693_v13  ;;  %v1695_v10 = vadd.f32 %v1564_v56, %v1453_v20 }
 0x4ed   : > { %v1566_v12 = vpop.f32.mrf.mxu1 }
 0x4ee   : > { %1719 = vst [vmem:[#allocation4 + $0xb8] sm:$0xff] %v1695_v10  ;;  %v1696_v28 = vadd.f32 %v1566_v12, %v1454_v7 }
 0x4ef   : > { %v2186_v3 = vpop.f32.mrf.mxu1 }
 0x4f0   : > { %1720 = vst [vmem:[#allocation4 + $0x20] sm:$0xff] %v1696_v28  ;;  %v1679_v63 = vadd.f32 %v2186_v3, %v1437_v50 }
 0x4f1   : > { %v1635_v2 = vpop.f32.mrf.mxu1 }
 0x4f2   : > { %1703 = vst [vmem:[#allocation4 + $0x28] sm:$0xff] %v1679_v63  ;;  %v1676_v61 = vadd.f32 %v1635_v2, %v1434_v62 }
 0x4f3   : > { %v2189_v15 = vpop.f32.mrf.mxu1 }
 0x4f4   : > { %1700 = vst [vmem:[#allocation4 + $0x10] sm:$0xff] %v1676_v61  ;;  %v1685_v38 = vadd.f32 %v2189_v15, %v1443_v11 }
 0x4f5   : > { %v1645_v34 = vpop.f32.mrf.mxu1 }
 0x4f6   : > { %1709 = vst [vmem:[#allocation4 + $0x98] sm:$0xff] %v1685_v38  ;;  %v1682_v59 = vadd.f32 %v1645_v34, %v1440_v47 }
 0x4f7   : > { %v2192_v19 = vpop.f32.mrf.mxu1 }
 0x4f8   : > { %1706 = vst [vmem:[#allocation4 + $0x88] sm:$0xff] %v1682_v59  ;;  %v1691_v29 = vadd.f32 %v2192_v19, %v1449_v55 }
 0x4f9   : > { %v1655_v6 = vpop.f32.mrf.mxu1 }
 0x4fa   : > { %1715 = vst [vmem:[#allocation4 + $0x68] sm:$0xff] %v1691_v29  ;;  %v1688_v23 = vadd.f32 %v1655_v6, %v1446_v5 }
 0x4fb   : > { %v2195_v9 = vpop.f32.mrf.mxu1 }
 0x4fc   : > { %1712 = vst [vmem:[#allocation4 + $0x70] sm:$0xff] %v1688_v23  ;;  %v1697_v51 = vadd.f32 %v2195_v9, %v1455_v32  ;;  %1733 = sbr.rel (%p2056_p12) target bundleno = 1440 (0x5a0), region = 64 }
 0x4fd   : > { %v1665_v18 = vpop.f32.mrf.mxu1 }
 0x4fe   : > { %1721 = vst [vmem:[#allocation4 + $0x8] sm:$0xff] %v1697_v51  ;;  %v1694_v30 = vadd.f32 %v1665_v18, %v1452_v14 }
 0x500   : > { %1718 = vst [vmem:[#allocation4 + $0x80] sm:$0xff] %v1694_v30 }
 0x501   : > { %v1760_v40 = vld [vmem:[#allocation3 + $0x10] sm:$0xff]  ;;  %v1758_v37 = vld [vmem:[#allocation3] sm:$0xff]  ;;  %v2696_v41 = vmov 0   ;;  %v1761_v26 = vld [vmem:[#allocation3 + $0x18] sm:$0xff]  ;;  %v1840_v54 = vlaneseq }
 0x502   : > { %2399 = vset.pattern.permute.xlu1 %v2696_v41  ;;  %2398 = vset.pattern.permute.xlu0 %v2696_v41  ;;  %v1759_v43 = vld [vmem:[#allocation3 + $0x8] sm:$0xff]  ;;  %v1762_v46 = vld [vmem:[#allocation3 + $0x20] sm:$0xff]  ;;  %v1765_v42 = vld [vmem:[#allocation3 + $0x38] sm:$0xff] }
 0x503   : > { %1778 = vperm.xlu1 %2399, %v1760_v40   ;;  %1768 = vperm.xlu0 %2398, %v1758_v37   ;;  %v1763_v33 = vld [vmem:[#allocation3 + $0x28] sm:$0xff]  ;;  %v1764_v36 = vld [vmem:[#allocation3 + $0x30] sm:$0xff]  ;;  %v1841_v57 = vshrl.u32 %v1840_v54, 7  ;;  %v1838_v48 = vld [vmem:[%s4246_s30] sm:$0x7] }
 0x504   : > { %v1740_v44 = vld [vmem:[#allocation4 + $0x40] sm:$0xff]  ;;  %v1741_v53 = vld [vmem:[#allocation4 + $0x78] sm:$0xff]  ;;  %v1742_v35 = vld [vmem:[#allocation4 + $0x88] sm:$0xff] }
 0x505   : > { %v1842_v21 = vsub.s32 0, %v1841_v57  ;;  %v1846_v31 = vsub.s32 1, %v1841_v57  ;;  %v1850_v52 = vsub.s32 2, %v1841_v57  ;;  %v1734_v7 = vld [vmem:[#allocation4 + $0xb0] sm:$0xff]  ;;  %v1735_v10 = vld [vmem:[#allocation4] sm:$0xff]  ;;  %v1744_v61 = vld [vmem:[#allocation4 + $0x18] sm:$0xff] }
 0x506   : > { %v1736_v12 = vld [vmem:[#allocation4 + $0x10] sm:$0xff]  ;;  %v1745_v11 = vld [vmem:[#allocation4 + $0x98] sm:$0xff]  ;;  %v1737_v47 = vld [vmem:[#allocation4 + $0x48] sm:$0xff] }
 0x507   : > { %1783 = vperm.xlu1 %2399, %v1761_v26   ;;  %1773 = vperm.xlu0 %2398, %v1759_v43   ;;  %v3878_v13 = vrot.slane %v1838_v48, %v1842_v21  ;;  %v3880_v56 = vrot.slane %v1838_v48, %v1846_v31  ;;  %v3882_v16 = vrot.slane %v1838_v48, %v1850_v52  ;;  %v1743_v45 = vld [vmem:[#allocation4 + $0x90] sm:$0xff]  ;;  %v1738_v34 = vld [vmem:[#allocation4 + $0x60] sm:$0xff]  ;;  %v1739_v0 = vld [vmem:[#allocation4 + $0x28] sm:$0xff] }
 0x508   : > { %v1749_v14 = vld [vmem:[#allocation4 + $0xa0] sm:$0xff]  ;;  %v1750_v51 = vld [vmem:[#allocation4 + $0xa8] sm:$0xff]  ;;  %v1746_v41 = vld [vmem:[#allocation4 + $0x38] sm:$0xff] }
 0x509   : > { %v1751_v18 = vld [vmem:[#allocation4 + $0x68] sm:$0xff]  ;;  %v1747_v26 = vld [vmem:[#allocation4 + $0x50] sm:$0xff]  ;;  %v1756_v21 = vld [vmem:[#allocation4 + $0x20] sm:$0xff] }
 0x50a   : > { %v1748_v43 = vld [vmem:[#allocation4 + $0x70] sm:$0xff]  ;;  %v1757_v31 = vld [vmem:[#allocation4 + $0x8] sm:$0xff] }
 0x50b   : > { %1793 = vperm.xlu1 %2399, %v1763_v33   ;;  %1788 = vperm.xlu0 %2398, %v1762_v46  }
 0x50f   : > { %1803 = vperm.xlu1 %2399, %v1765_v42   ;;  %1798 = vperm.xlu0 %2398, %v1764_v36  }
 0x57e   : > { %v1779_v17 = vpop.permute.xlu1 %1778  ;;  %v1769_v4 = vpop.permute.xlu0 %1768 }
 0x57f   : > { %2400 = vrcp.f32 %v1779_v17 }
 0x580   : > { %2402 = vrcp.f32 %v1769_v4 }
 0x582   : > { %v1784_v58 = vpop.permute.xlu1 %1783  ;;  %v1774_v49 = vpop.permute.xlu0 %1773 }
 0x583   : > { %2404 = vrcp.f32 %v1784_v58 }
 0x584   : > { %2406 = vrcp.f32 %v1774_v49 }
 0x586   : > { %v1794_v22 = vpop.permute.xlu1 %1793  ;;  %v1789_v60 = vpop.permute.xlu0 %1788 }
 0x587   : > { %2408 = vrcp.f32 %v1794_v22 }
 0x588   : > { %2410 = vrcp.f32 %v1789_v60  ;;  %v1755_v60 = vld [vmem:[#allocation4 + $0xb8] sm:$0xff] }
 0x58a   : > { %v1804_v27 = vpop.permute.xlu1 %1803  ;;  %v1799_v20 = vpop.permute.xlu0 %1798 }
 0x58b   : > { %2412 = vrcp.f32 %v1804_v27  ;;  %v1754_v27 = vld [vmem:[#allocation4 + $0x80] sm:$0xff] }
 0x58c   : > { %v2401_v1 = vpop.eup %2400  ;;  %2414 = vrcp.f32 %v1799_v20 }
 0x58d   : > { %v2403_v28 = vpop.eup %2402  ;;  %v1815_v50 = vmul.f32 %v2401_v1, %v1740_v44  ;;  %v1816_v3 = vmul.f32 %v2401_v1, %v1741_v53  ;;  %v1817_v24 = vmul.f32 %v2401_v1, %v1742_v35  ;;  %v1752_v53 = vld [vmem:[#allocation4 + $0x30] sm:$0xff]  ;;  %v1753_v35 = vld [vmem:[#allocation4 + $0x58] sm:$0xff] }
 0x58e   : > { %v1807_v63 = vmul.f32 %v2403_v28, %v1734_v7  ;;  %v1808_v62 = vmul.f32 %v2403_v28, %v1735_v10  ;;  %v1809_v2 = vmul.f32 %v2403_v28, %v1736_v12 }
 0x58f   : > { %v1861_v15 = vadd.f32 %v3878_v13, %v1815_v50  ;;  %v1862_v25 = vadd.f32 %v3880_v56, %v1816_v3  ;;  %v1863_v38 = vadd.f32 %v3882_v16, %v1817_v24 }
 0x590   : > { %v2405_v59 = vpop.eup %2404  ;;  %v1855_v55 = vadd.f32 %v3878_v13, %v1807_v63  ;;  %v1856_v8 = vadd.f32 %v3880_v56, %v1808_v62  ;;  %v1857_v19 = vadd.f32 %v3882_v16, %v1809_v2 }
 0x591   : > { %v2407_v29 = vpop.eup %2406  ;;  %1885 = vst [vmem:[%s3258_s9 + $0x30] sm:$0xff] %v1861_v15  ;;  %1886 = vst [vmem:[%s3258_s9 + $0x38] sm:$0xff] %v1862_v25  ;;  %v1819_v5 = vmul.f32 %v2405_v59, %v1743_v45  ;;  %v1820_v39 = vmul.f32 %v2405_v59, %v1744_v61  ;;  %v1821_v6 = vmul.f32 %v2405_v59, %v1745_v11 }
 0x592   : > { %1887 = vst [vmem:[%s3258_s9 + $0x40] sm:$0xff] %v1863_v38  ;;  %1879 = vst [vmem:[%s3258_s9] sm:$0xff] %v1855_v55  ;;  %v1811_v32 = vmul.f32 %v2407_v29, %v1737_v47  ;;  %v1812_v23 = vmul.f32 %v2407_v29, %v1738_v34  ;;  %v1813_v9 = vmul.f32 %v2407_v29, %v1739_v0 }
 0x593   : > { %1880 = vst [vmem:[%s3258_s9 + $0x8] sm:$0xff] %v1856_v8  ;;  %1881 = vst [vmem:[%s3258_s9 + $0x10] sm:$0xff] %v1857_v19  ;;  %v1864_v30 = vadd.f32 %v3878_v13, %v1819_v5  ;;  %v1865_v40 = vadd.f32 %v3880_v56, %v1820_v39  ;;  %v1866_v37 = vadd.f32 %v3882_v16, %v1821_v6 }
 0x594   : > { %v2409_v33 = vpop.eup %2408  ;;  %v1858_v46 = vadd.f32 %v3878_v13, %v1811_v32  ;;  %v1859_v42 = vadd.f32 %v3880_v56, %v1812_v23  ;;  %v1860_v36 = vadd.f32 %v3882_v16, %v1813_v9 }
 0x595   : > { %v2411_v17 = vpop.eup %2410  ;;  %1888 = vst [vmem:[%s3258_s9 + $0x48] sm:$0xff] %v1864_v30  ;;  %1889 = vst [vmem:[%s3258_s9 + $0x50] sm:$0xff] %v1865_v40  ;;  %v1827_v4 = vmul.f32 %v2409_v33, %v1749_v14  ;;  %v1828_v54 = vmul.f32 %v2409_v33, %v1750_v51  ;;  %v1829_v58 = vmul.f32 %v2409_v33, %v1751_v18 }
 0x596   : > { %1890 = vst [vmem:[%s3258_s9 + $0x58] sm:$0xff] %v1866_v37  ;;  %1882 = vst [vmem:[%s3258_s9 + $0x18] sm:$0xff] %v1858_v46  ;;  %v1823_v49 = vmul.f32 %v2411_v17, %v1746_v41  ;;  %v1824_v57 = vmul.f32 %v2411_v17, %v1747_v26  ;;  %v1825_v22 = vmul.f32 %v2411_v17, %v1748_v43 }
 0x597   : > { %1883 = vst [vmem:[%s3258_s9 + $0x20] sm:$0xff] %v1859_v42  ;;  %1884 = vst [vmem:[%s3258_s9 + $0x28] sm:$0xff] %v1860_v36  ;;  %v1870_v52 = vadd.f32 %v3878_v13, %v1827_v4  ;;  %v1871_v48 = vadd.f32 %v3880_v56, %v1828_v54  ;;  %v1872_v44 = vadd.f32 %v3882_v16, %v1829_v58 }
 0x598   : > { %v2413_v20 = vpop.eup %2412  ;;  %v1867_v7 = vadd.f32 %v3878_v13, %v1823_v49  ;;  %v1868_v10 = vadd.f32 %v3880_v56, %v1824_v57  ;;  %v1869_v12 = vadd.f32 %v3882_v16, %v1825_v22 }
 0x599   : > { %v2415_v1 = vpop.eup %2414  ;;  %1894 = vst [vmem:[%s3258_s9 + $0x78] sm:$0xff] %v1870_v52  ;;  %1895 = vst [vmem:[%s3258_s9 + $0x80] sm:$0xff] %v1871_v48  ;;  %v1835_v28 = vmul.f32 %v2413_v20, %v1755_v60  ;;  %v1836_v50 = vmul.f32 %v2413_v20, %v1756_v21  ;;  %v1837_v3 = vmul.f32 %v2413_v20, %v1757_v31 }
 0x59a   : > { %1896 = vst [vmem:[%s3258_s9 + $0x88] sm:$0xff] %v1872_v44  ;;  %1891 = vst [vmem:[%s3258_s9 + $0x60] sm:$0xff] %v1867_v7  ;;  %v1831_v24 = vmul.f32 %v2415_v1, %v1752_v53  ;;  %v1832_v63 = vmul.f32 %v2415_v1, %v1753_v35  ;;  %v1833_v62 = vmul.f32 %v2415_v1, %v1754_v27 }
 0x59b   : > { %1892 = vst [vmem:[%s3258_s9 + $0x68] sm:$0xff] %v1868_v10  ;;  %1893 = vst [vmem:[%s3258_s9 + $0x70] sm:$0xff] %v1869_v12  ;;  %v1876_v2 = vadd.f32 %v3878_v13, %v1835_v28  ;;  %v1877_v45 = vadd.f32 %v3880_v56, %v1836_v50  ;;  %v1878_v61 = vadd.f32 %v3882_v16, %v1837_v3 }
 0x59c   : > { %v1873_v11 = vadd.f32 %v3878_v13, %v1831_v24  ;;  %v1874_v15 = vadd.f32 %v3880_v56, %v1832_v63  ;;  %v1875_v25 = vadd.f32 %v3882_v16, %v1833_v62 }
 0x59d   : > { %1900 = vst [vmem:[%s3258_s9 + $0xa8] sm:$0xff] %v1876_v2  ;;  %1901 = vst [vmem:[%s3258_s9 + $0xb0] sm:$0xff] %v1877_v45 }
 0x59e   : > { %1902 = vst [vmem:[%s3258_s9 + $0xb8] sm:$0xff] %v1878_v61  ;;  %1897 = vst [vmem:[%s3258_s9 + $0x90] sm:$0xff] %v1873_v11 }
 0x59f   : > { %1898 = vst [vmem:[%s3258_s9 + $0x98] sm:$0xff] %v1874_v15  ;;  %1899 = vst [vmem:[%s3258_s9 + $0xa0] sm:$0xff] %v1875_v25 }
 0x5a0 PF: > { %s4247_s10 = sld [smem:[#allocation22_spill]]  ;;  %s1917_s3 = sshll.u32 %s3258_s9, 4  ;;  %s3939_s3 = int_to_ptr.vmem [resolvable:$true] %s1917_s3 }
 0x5a1   : > { %s4249_s15 = sld [smem:[#allocation25_spill]]  ;;  %s3943_s19 = scalar_lea.sflag [#allocation7], %s314_s17 }
 0x5a2   : > { %s4250_s29 = sld [smem:[#allocation108_spill]]  ;;  %s2524_s27 = scalar_lea.vmem %s3939_s3, 3072 }
 0x5a3   : > { %p2525_p3 = scmp.ne.s32.totalorder %s3939_s3, %s2524_s27  ;;  %s2697_s0 = smov [#allocation12]  }
 0x5a4   : > { %s2528_s7 = sshll.u32 %s2697_s0, 4  ;;  %s2529_s7 = int_to_ptr.vmem [resolvable:$false] %s2528_s7 }
 0x5a5   : > { %s2530_s2 = scalar_lea.vmem %s2529_s7, 6144  ;;  %p2531_p7 = scmp.lt.s32.totalorder %s3939_s3, %s2529_s7 }
 0x5a6   : > { %s2198_s5 = smul.u32 3072, %s4247_s10  ;;  %p2532_p8 = scmp.lt.s32.totalorder %s2530_s2, %s2524_s27 }
 0x5a7   : > { %p4252_p6 = scmp.ne.s32.totalorder %s4249_s15, 0 }
 0x5a8   : > { %s4251_s12 = smov %s4250_s29  ;;  %s3937_s18 = scalar_lea.hbm %s4250_s29, %s2198_s5 }
 0x5a9   : > { %p2526_p13 = pnand %p2525_p3, %p4252_p6  ;;  %p2533_p10 = por %p2532_p8, %p2531_p7 }
 0x5ab   : > { %p2527_p5 = pneg %p2526_p13 }
 0x5ad   : > { %p2534_p0 = pnand %p2533_p10, %p2527_p5 }
 0x5af   : > { %2537 = shalt.err (!%p2534_p0)
}
 0x5b0   : > { %s2538_s17 = scalar_lea.hbm %s3937_s18, 3072  ;;  %s2542_s28 = scalar_lea.hbm %s4251_s12, 6144 }
 0x5b1   : > { %p2539_p4 = scmp.ne.s32.totalorder %s3937_s18, %s2538_s17  ;;  %p2543_p1 = scmp.lt.s32.totalorder %s3937_s18, %s4251_s12 }
 0x5b2   : > { %p2544_p2 = scmp.lt.s32.totalorder %s2542_s28, %s2538_s17 }
 0x5b3   : > { %p2540_p9 = pnand %p2539_p4, %p4252_p6 }
 0x5b4   : > { %p2545_p12 = por %p2544_p2, %p2543_p1 }
 0x5b5   : > { %p2541_p11 = pneg %p2540_p9 }
 0x5b7   : > { %p2546_p3 = pnand %p2545_p12, %p2541_p11 }
 0x5b9   : > { %2549 = shalt.err (!%p2546_p3)
}
 0x5ba   : > { %s2698_s30 = smov 384   ;;  %s2699_s10 = smov 24  }
 0x5bb   : > { %2211 = dma.vmem_to_hbm [thread:$0]  (%p4252_p6), %s3939_s3, 3072, %s3937_s18, %s3943_s19, %s2698_s30, %s2698_s30, %s2699_s10  }
 0x5bc PF: > { %s4253_s24 = sld [smem:[#allocation18_spill]]  ;;  %p2236_p13 = scmp.ge.s32.totalorder %s2680_s6, 2 }
 0x5bd   : > { %s4254_s5 = sld [smem:[#allocation26_spill]] }
 0x5c2   : > { %s1932_s13 = sand.u32 1, %s4253_s24  }
 0x5c3   : > { %p4255_p5 = scmp.ne.s32.totalorder %s4254_s5, 0  ;;  %s1933_s26 = scalar_lea.sflag [#allocation7], %s1932_s13 }
 0x5c5   : > { %p2228_p7 = pnand %p2236_p13, %p4255_p5 }
 0x5c7   : > { %p2229_p8 = pneg %p2228_p7 }
 0x5c9   : > { %2623 = dma.done.wait (%p2229_p8), %s1933_s26, 3072  }
 0x5ca   : > { %2625 = vsyncadd (%p2229_p8), %s1933_s26, 4294964224  ;;  %s20_s6 = sadd.s32 1, %s2680_s6   ;;  %s4257_s18 = sld [smem:[#allocation19_spill]] }
 0x5cb   : > { %p3971_p10 = scmp.ge.s32.totalorder %s20_s6, 8   ;;  %s4258_s15 = sld [smem:[#allocation20_spill]] }
 0x5cc   : > { %s4259_s26 = sld [smem:[#allocation29_spill]]  ;;  %s4265_s19 = smov %s2636_s20 }
 0x5cd   : > { %s4260_s27 = sld [smem:[#allocation23_spill]]  ;;  %s4266_s20 = smov %s2893_s21 }
 0x5ce   : > { %s4261_s28 = sld [smem:[#allocation24_spill]]  ;;  %s4267_s21 = smov %s2644_s22 }
 0x5cf   : > { %s4262_s3 = sld [smem:[#allocation27_spill]]  ;;  %s4268_s22 = smov %s2648_s23 }
 0x5d0   : > { %s4263_s30 = sld [smem:[#allocation28_spill]]  ;;  %s4269_s23 = smov %s2890_s16 }
 0x5d1   : > { %s4270_s24 = smov %s2656_s25  ;;  %s4271_s25 = smov %s4258_s15 }
 0x5d2   :  { %19 = sbr.rel (!%p3971_p10) target bundleno = 15 (0xf), region = 111 }
 0x5d5   : > { %s4272_s29 = smov %s4262_s3 }
 0x5d7   :  { %1938 = vsyncpa [#allocation6], 1 }
 0x5d8   :  { %1940 = vsyncpa [#allocation6 + $0x1], 1 }
 0x5d9   :  { %1941 = vsyncpa [#allocation9], 1 }
 0x5da   :  { %1942 = vsyncpa [#allocation7], 1 }
 0x5db   :  { %1944 = vsyncpa [#allocation7 + $0x1], 1 }

</bundles_post_ra>
